<compile_context>
chip_gen: v5e
topology: v5e:2x2
jax: 0.10.0
libtpu: 0.0.40
codegen_flags: <defaults>
</compile_context>

<pallas_src>
import functools
import math

import jax
import jax.numpy as jnp
from jax import lax
from jax.experimental import pallas as pl
from jax.experimental.pallas import tpu as pltpu


# ---------------------------------------------------------------------------
# Fused encoder kernel: embedding + hoisted per-gate input proj + GRU recurrence
# ---------------------------------------------------------------------------
def _encoder_kernel(tok_ref, table_ref, w_i_ref, w_h_ref, b_ref, h0_ref,
                    emb_ref, hid_ref, gr_s, gz_s, gn_s,
                    *, seq_len, unroll):
    c = pl.program_id(1)                       # time-chunk index (serial axis)
    nc = pl.num_programs(1)

    tT, bb = tok_ref.shape[0], tok_ref.shape[1]
    V, E = table_ref.shape
    H = w_h_ref.shape[1]
    rows = tT * bb                             # time-major: row = t*bb + b

    # ---- hidden carry lives in the resident output block ------------------
    @pl.when(c == 0)
    def _():
        hid_ref[...] = h0_ref[...]

    # ---- embedding lookup for this chunk (one-hot @ table on the MXU) -----
    # OOB token ids would yield zero rows (nn.Embedding would raise instead).
    tok = tok_ref[...].reshape(rows, 1)                            # int32
    onehot = (lax.broadcasted_iota(jnp.int32, (rows, V), 1) == tok
              ).astype(jnp.float32)
    emb_tm = jnp.dot(onehot, table_ref[...],
                     preferred_element_type=jnp.float32)           # (rows, E)

    # ---- batch-major, lane-dense embedded output (block = (bb, tT*E)) -----
    # tT small static slice-stores per chunk; the HBM-visible row per batch
    # element is tT*E (>=128) contiguous lanes.
    for t in range(tT):
        emb_ref[:, t * E:(t + 1) * E] = emb_tm[t * bb:(t + 1) * bb, :]

    # ---- hoisted per-gate input projections (r/z biases pre-folded) -------
    gi_r = jnp.dot(emb_tm, w_i_ref[0],
                   preferred_element_type=jnp.float32) + b_ref[0:1, :]
    gi_z = jnp.dot(emb_tm, w_i_ref[1],
                   preferred_element_type=jnp.float32) + b_ref[1:2, :]
    gi_n = jnp.dot(emb_tm, w_i_ref[2],
                   preferred_element_type=jnp.float32) + b_ref[2:3, :]

    w_hr = w_h_ref[0]                                              # (H, H)
    w_hz = w_h_ref[1]
    w_hn = w_h_ref[2]
    b_hn = jnp.broadcast_to(b_ref[3:4, :], (bb, H))   # hoisted out of the loop

    # TODO(synk): pin w_hr/w_hz/w_hn in MXU weight registers across the chunk
    # via pltpu.matmul_push_rhs / matmul_acc_lhs / matmul_pop.
    def make_step(load_gi, masked):
        def step(t, h):
            gr, gz, gn = load_gi(t)
            ghr = jnp.dot(h, w_hr, preferred_element_type=jnp.float32)
            ghz = jnp.dot(h, w_hz, preferred_element_type=jnp.float32)
            ghn = jnp.dot(h, w_hn, preferred_element_type=jnp.float32)
            r = jax.nn.sigmoid(gr + ghr)
            z = jax.nn.sigmoid(gz + ghz)
            n = jnp.tanh(gn + r * (ghn + b_hn))
            h_new = (1.0 - z) * n + z * h
            if masked:                          # only traced for the last chunk
                valid = (c * tT + t) < seq_len
                h_new = jnp.where(valid, h_new, h)
            return h_new
        return step

    small = tT <= 32
    if not small:
        # Stage gi in VMEM so the fori_loop body can slice it with pl.ds.
        gr_s[...] = gi_r
        gz_s[...] = gi_z
        gn_s[...] = gi_n

    def run(h, masked):
        if small:
            # Full unroll with static, contiguous sublane slices.
            load = lambda t: (gi_r[t * bb:(t + 1) * bb, :],
                              gi_z[t * bb:(t + 1) * bb, :],
                              gi_n[t * bb:(t + 1) * bb, :])
            step = make_step(load, masked)
            for t in range(tT):
                h = step(t, h)
            return h

        def load(t):
            r0 = pl.multiple_of(t * bb, bb)
            return (gr_s[pl.ds(r0, bb), :],
                    gz_s[pl.ds(r0, bb), :],
                    gn_s[pl.ds(r0, bb), :])
        return lax.fori_loop(0, tT, make_step(load, masked), h, unroll=unroll)

    h_in = hid_ref[...]
    if seq_len % tT == 0:
        hid_ref[...] = run(h_in, False)
    else:
        # Only the last chunk pays the per-step tail-mask select.
        @pl.when(c != nc - 1)
        def _():
            hid_ref[...] = run(h_in, False)

        @pl.when(c == nc - 1)
        def _():
            hid_ref[...] = run(h_in, True)


# ---------------------------------------------------------------------------
# Wrapper
# ---------------------------------------------------------------------------
def encoder_forward(tokens, params, hidden=None, *,
                    time_chunk=None, batch_block=None):
    """tokens: (B, T) int32 -> (embedded (B, T, E) f32, hidden (1, B, H) f32)."""
    B, T = tokens.shape
    table = params["embedding"].astype(jnp.float32)          # (V, E)
    V, E = table.shape
    w_ih = params["w_ih"].astype(jnp.float32)                # (3H, E) [r|z|n]
    w_hh = params["w_hh"].astype(jnp.float32)                # (3H, H)
    H = w_hh.shape[1]

    # Per-gate, pre-transposed weights (no in-kernel .T / lane slicing).
    w_i = jnp.transpose(w_ih.reshape(3, H, E), (0, 2, 1))    # (3, E, H)
    w_h = jnp.transpose(w_hh.reshape(3, H, H), (0, 2, 1))    # (3, H, H)

    b_ih = params["b_ih"].reshape(3, H).astype(jnp.float32)
    b_hh = params["b_hh"].reshape(3, H).astype(jnp.float32)
    biases = jnp.stack([b_ih[0] + b_hh[0],   # r-gate: both biases folded
                        b_ih[1] + b_hh[1],   # z-gate: both biases folded
                        b_ih[2],             # n-gate: input bias
                        b_hh[2]])            # n-gate: hidden bias (inside r*(.))

    if hidden is None:                       # Encoder.initHidden
        hidden = jnp.zeros((1, B, H), jnp.float32)
    h0 = hidden.reshape(B, H).astype(jnp.float32)

    # ---- chunking: target >=256 time-major rows per chunk, cap at T -------
    t_cap = -(-T // 8) * 8
    if time_chunk is None:
        tc = min(-(-max(1, 256 // B) // 8) * 8, t_cap)
        if (tc * E) % 128 != 0:              # keep the emb out block lane-legal
            tc = t_cap
    else:
        tc = time_chunk
        assert tc % 8 == 0, "time_chunk must be a multiple of 8"
    num_chunks = -(-T // tc)
    T_pad = num_chunks * tc
    assert num_chunks == 1 or (tc * E) % 128 == 0

    bb = B if batch_block is None else batch_block
    assert bb == B or (B % bb == 0 and bb % 8 == 0)
    nb = B // bb

    pad = T_pad - T
    tokens_p = jnp.pad(tokens, ((0, 0), (0, pad))) if pad else tokens
    tok_tm = jnp.transpose(tokens_p).reshape(T_pad, B, 1).astype(jnp.int32)

    kernel = functools.partial(_encoder_kernel, seq_len=T, unroll=8)
    rows = tc * bb

    emb_flat, hid = pl.pallas_call(
        kernel,
        out_shape=(jax.ShapeDtypeStruct((B, T_pad * E), jnp.float32),
                   jax.ShapeDtypeStruct((B, H), jnp.float32)),
        grid_spec=pltpu.PrefetchScalarGridSpec(
            num_scalar_prefetch=0,
            grid=(nb, num_chunks),
            in_specs=[
                pl.BlockSpec((tc, bb, 1), lambda bi, c: (c, bi, 0)),   # tokens
                pl.BlockSpec((V, E), lambda bi, c: (0, 0)),            # table
                pl.BlockSpec((3, E, H), lambda bi, c: (0, 0, 0)),      # W_i^T
                pl.BlockSpec((3, H, H), lambda bi, c: (0, 0, 0)),      # W_h^T
                pl.BlockSpec((4, H), lambda bi, c: (0, 0)),            # biases
                pl.BlockSpec((bb, H), lambda bi, c: (bi, 0)),          # h0
            ],
            out_specs=[
                pl.BlockSpec((bb, tc * E), lambda bi, c: (bi, c)),     # embedded
                pl.BlockSpec((bb, H), lambda bi, c: (bi, 0)),          # hidden
            ],
            scratch_shapes=[pltpu.VMEM((rows, H), jnp.float32)] * 3,   # gi stage
        ),
        compiler_params=pltpu.CompilerParams(
            dimension_semantics=("parallel", "arbitrary")),
    )(tok_tm, table, w_i, w_h, biases, h0)

    embedded = emb_flat.reshape(B, T_pad, E)[:, :T, :]
    # bidirectional=False -> no concat of embedded
    return embedded, hid.reshape(1, B, H)


# ---------------------------------------------------------------------------
# Pure-JAX reference (for correctness check)
# ---------------------------------------------------------------------------
def _reference_forward(tokens, params):
    table = params["embedding"]
    H = params["w_hh"].shape[1]
    emb = table[tokens]                                    # (B, T, E)
    h = jnp.zeros((tokens.shape[0], H), jnp.float32)
    w_ih, w_hh = params["w_ih"], params["w_hh"]
    b_ih, b_hh = params["b_ih"][0], params["b_hh"][0]
    for t in range(tokens.shape[1]):
        x = emb[:, t, :]
        gi = x @ w_ih.T + b_ih
        gh = h @ w_hh.T + b_hh
        r = jax.nn.sigmoid(gi[:, :H] + gh[:, :H])
        z = jax.nn.sigmoid(gi[:, H:2 * H] + gh[:, H:2 * H])
        n = jnp.tanh(gi[:, 2 * H:] + r * gh[:, 2 * H:])
        h = (1.0 - z) * n + z * h
    return emb, h[None]


# ---------------------------------------------------------------------------
# Main
# ---------------------------------------------------------------------------
if __name__ == "__main__":
    B, T = 2, 8           # batch, sequence length
    V, E, H = 20, 32, 32  # vocab, embedding_dim, hidden_size

    key = jax.random.PRNGKey(0)
    k_emb, k_wih, k_whh, k_bih, k_bhh, k_tok = jax.random.split(key, 6)

    bound = 1.0 / math.sqrt(H)
    params = {
        "embedding": jax.random.normal(k_emb, (V, E), jnp.float32),
        "w_ih": jax.random.uniform(k_wih, (3 * H, E), jnp.float32, -bound, bound),
        "w_hh": jax.random.uniform(k_whh, (3 * H, H), jnp.float32, -bound, bound),
        "b_ih": jax.random.uniform(k_bih, (1, 3 * H), jnp.float32, -bound, bound),
        "b_hh": jax.random.uniform(k_bhh, (1, 3 * H), jnp.float32, -bound, bound),
    }

    tokens = jax.random.randint(k_tok, (B, T), 0, V, dtype=jnp.int32)

    embedded, hidden = encoder_forward(tokens, params)
    jax.block_until_ready((embedded, hidden))

    emb_ref, hid_ref = _reference_forward(tokens, params)
    assert embedded.shape == (B, T, E) and hidden.shape == (1, B, H)
    assert jnp.allclose(embedded, emb_ref, atol=2e-3, rtol=2e-3)
    assert jnp.allclose(hidden, hid_ref, atol=2e-3, rtol=2e-3)

    print("KERNEL_OK")
</pallas_src>

<mosaic_0001>
module attributes {stable_mosaic.version = 11 : i64} {
  func.func @_encoder_kernel(%arg0: i32, %arg1: i32, %arg2: memref<8x2x1xi32, #tpu.memory_space<vmem>>, %arg3: memref<20x32xf32, #tpu.memory_space<vmem>>, %arg4: memref<3x32x32xf32, #tpu.memory_space<vmem>>, %arg5: memref<3x32x32xf32, #tpu.memory_space<vmem>>, %arg6: memref<4x32xf32, #tpu.memory_space<vmem>>, %arg7: memref<2x32xf32, #tpu.memory_space<vmem>>, %arg8: memref<2x256xf32, #tpu.memory_space<vmem>>, %arg9: memref<2x32xf32, #tpu.memory_space<vmem>>, %arg10: memref<16x32xf32, #tpu.memory_space<vmem>>, %arg11: memref<16x32xf32, #tpu.memory_space<vmem>>, %arg12: memref<16x32xf32, #tpu.memory_space<vmem>>) attributes {dimension_semantics = [#tpu.dimension_semantics<parallel>, #tpu.dimension_semantics<arbitrary>], iteration_bounds = array<i64: 1, 1>, scalar_prefetch = 0 : i64, scratch_operands = 3 : i64, tpu.core_type = #tpu.core_type<tc>, window_params = [{transform_indices = @transform_0, window_bounds = array<i64: 8, 2, 1>}, {pipeline_mode = #tpu.pipeline_mode<synchronous>, transform_indices = @transform_1, window_bounds = array<i64: 20, 32>}, {pipeline_mode = #tpu.pipeline_mode<synchronous>, transform_indices = @transform_2, window_bounds = array<i64: 3, 32, 32>}, {pipeline_mode = #tpu.pipeline_mode<synchronous>, transform_indices = @transform_3, window_bounds = array<i64: 3, 32, 32>}, {pipeline_mode = #tpu.pipeline_mode<synchronous>, transform_indices = @transform_4, window_bounds = array<i64: 4, 32>}, {transform_indices = @transform_5, window_bounds = array<i64: 2, 32>}, {transform_indices = @transform_6, window_bounds = array<i64: 2, 256>}, {transform_indices = @transform_7, window_bounds = array<i64: 2, 32>}]} {
    %c0_i32 = arith.constant 0 : i32
    %0 = arith.cmpi eq, %arg1, %c0_i32 : i32
    %1 = arith.extui %0 : i1 to i32
    %c0_i32_0 = arith.constant 0 : i32
    %2 = arith.cmpi ne, %1, %c0_i32_0 : i32
    scf.if %2 {
      %c0_92 = arith.constant 0 : index
      %c0_93 = arith.constant 0 : index
      %273 = vector.load %arg7[%c0_92, %c0_93] : memref<2x32xf32, #tpu.memory_space<vmem>>, vector<2x32xf32>
      %c0_94 = arith.constant 0 : index
      %c0_95 = arith.constant 0 : index
      %274 = vector.load %arg9[%c0_94, %c0_95] : memref<2x32xf32, #tpu.memory_space<vmem>>, vector<2x32xf32>
      tpu.vector_store %arg9[%c0_94, %c0_95], %273 {strides = array<i32>} : memref<2x32xf32, #tpu.memory_space<vmem>>, vector<2x32xf32>,
    } else {
    }
    %c0 = arith.constant 0 : index
    %c0_1 = arith.constant 0 : index
    %c0_2 = arith.constant 0 : index
    %3 = vector.load %arg2[%c0, %c0_1, %c0_2] : memref<8x2x1xi32, #tpu.memory_space<vmem>>, vector<8x2x1xi32>
    %4 = vector.shape_cast %3 : vector<8x2x1xi32> to vector<16x1xi32>
    %5 = tpu.iota {dimensions = array<i32: 1>} : vector<16x20xi32>
    %6 = vector.broadcast %4 : vector<16x1xi32> to vector<16x20xi32>
    %7 = arith.cmpi eq, %5, %6 : vector<16x20xi32>
    %8 = arith.extui %7 : vector<16x20xi1> to vector<16x20xi32>
    %9 = arith.sitofp %8 : vector<16x20xi32> to vector<16x20xf32>
    %c0_3 = arith.constant 0 : index
    %c0_4 = arith.constant 0 : index
    %10 = vector.load %arg3[%c0_3, %c0_4] : memref<20x32xf32, #tpu.memory_space<vmem>>, vector<20x32xf32>
    %cst = arith.constant dense<0.000000e+00> : vector<16x32xf32>
    %11 = tpu.matmul %9, %10, %cst {dimension_numbers = #tpu.dot_dimension_numbers<[1], [0], [0], [1], [0, 0, 1, 1], [], []>} : vector<16x20xf32>, vector<20x32xf32>, vector<16x32xf32> -> vector<16x32xf32>
    %12 = vector.extract_strided_slice %11 {offsets = [0, 0], sizes = [2, 32], strides = [1, 1]} : vector<16x32xf32> to vector<2x32xf32>
    %c0_5 = arith.constant 0 : index
    %c0_6 = arith.constant 0 : index
    %13 = vector.load %arg8[%c0_5, %c0_6] : memref<2x256xf32, #tpu.memory_space<vmem>>, vector<2x32xf32>
    tpu.vector_store %arg8[%c0_5, %c0_6], %12 {strides = array<i32>} : memref<2x256xf32, #tpu.memory_space<vmem>>, vector<2x32xf32>,
    %14 = vector.extract_strided_slice %11 {offsets = [2, 0], sizes = [2, 32], strides = [1, 1]} : vector<16x32xf32> to vector<2x32xf32>
    %c0_7 = arith.constant 0 : index
    %c32 = arith.constant 32 : index
    %15 = vector.load %arg8[%c0_7, %c32] : memref<2x256xf32, #tpu.memory_space<vmem>>, vector<2x32xf32>
    tpu.vector_store %arg8[%c0_7, %c32], %14 {strides = array<i32>} : memref<2x256xf32, #tpu.memory_space<vmem>>, vector<2x32xf32>,
    %16 = vector.extract_strided_slice %11 {offsets = [4, 0], sizes = [2, 32], strides = [1, 1]} : vector<16x32xf32> to vector<2x32xf32>
    %c0_8 = arith.constant 0 : index
    %c64 = arith.constant 64 : index
    %17 = vector.load %arg8[%c0_8, %c64] : memref<2x256xf32, #tpu.memory_space<vmem>>, vector<2x32xf32>
    tpu.vector_store %arg8[%c0_8, %c64], %16 {strides = array<i32>} : memref<2x256xf32, #tpu.memory_space<vmem>>, vector<2x32xf32>,
    %18 = vector.extract_strided_slice %11 {offsets = [6, 0], sizes = [2, 32], strides = [1, 1]} : vector<16x32xf32> to vector<2x32xf32>
    %c0_9 = arith.constant 0 : index
    %c96 = arith.constant 96 : index
    %19 = vector.load %arg8[%c0_9, %c96] : memref<2x256xf32, #tpu.memory_space<vmem>>, vector<2x32xf32>
    tpu.vector_store %arg8[%c0_9, %c96], %18 {strides = array<i32>} : memref<2x256xf32, #tpu.memory_space<vmem>>, vector<2x32xf32>,
    %20 = vector.extract_strided_slice %11 {offsets = [8, 0], sizes = [2, 32], strides = [1, 1]} : vector<16x32xf32> to vector<2x32xf32>
    %c0_10 = arith.constant 0 : index
    %c128 = arith.constant 128 : index
    %21 = vector.load %arg8[%c0_10, %c128] : memref<2x256xf32, #tpu.memory_space<vmem>>, vector<2x32xf32>
    tpu.vector_store %arg8[%c0_10, %c128], %20 {strides = array<i32>} : memref<2x256xf32, #tpu.memory_space<vmem>>, vector<2x32xf32>,
    %22 = vector.extract_strided_slice %11 {offsets = [10, 0], sizes = [2, 32], strides = [1, 1]} : vector<16x32xf32> to vector<2x32xf32>
    %c0_11 = arith.constant 0 : index
    %c160 = arith.constant 160 : index
    %23 = vector.load %arg8[%c0_11, %c160] : memref<2x256xf32, #tpu.memory_space<vmem>>, vector<2x32xf32>
    tpu.vector_store %arg8[%c0_11, %c160], %22 {strides = array<i32>} : memref<2x256xf32, #tpu.memory_space<vmem>>, vector<2x32xf32>,
    %24 = vector.extract_strided_slice %11 {offsets = [12, 0], sizes = [2, 32], strides = [1, 1]} : vector<16x32xf32> to vector<2x32xf32>
    %c0_12 = arith.constant 0 : index
    %c192 = arith.constant 192 : index
    %25 = vector.load %arg8[%c0_12, %c192] : memref<2x256xf32, #tpu.memory_space<vmem>>, vector<2x32xf32>
    tpu.vector_store %arg8[%c0_12, %c192], %24 {strides = array<i32>} : memref<2x256xf32, #tpu.memory_space<vmem>>, vector<2x32xf32>,
    %26 = vector.extract_strided_slice %11 {offsets = [14, 0], sizes = [2, 32], strides = [1, 1]} : vector<16x32xf32> to vector<2x32xf32>
    %c0_13 = arith.constant 0 : index
    %c224 = arith.constant 224 : index
    %27 = vector.load %arg8[%c0_13, %c224] : memref<2x256xf32, #tpu.memory_space<vmem>>, vector<2x32xf32>
    tpu.vector_store %arg8[%c0_13, %c224], %26 {strides = array<i32>} : memref<2x256xf32, #tpu.memory_space<vmem>>, vector<2x32xf32>,
    %c0_14 = arith.constant 0 : index
    %c0_15 = arith.constant 0 : index
    %c0_16 = arith.constant 0 : index
    %28 = vector.load %arg4[%c0_14, %c0_15, %c0_16] : memref<3x32x32xf32, #tpu.memory_space<vmem>>, vector<1x32x32xf32>
    %29 = vector.shape_cast %28 : vector<1x32x32xf32> to vector<32x32xf32>
    %cst_17 = arith.constant dense<0.000000e+00> : vector<16x32xf32>
    %30 = tpu.matmul %11, %29, %cst_17 {dimension_numbers = #tpu.dot_dimension_numbers<[1], [0], [0], [1], [0, 0, 1, 1], [], []>} : vector<16x32xf32>, vector<32x32xf32>, vector<16x32xf32> -> vector<16x32xf32>
    %c0_18 = arith.constant 0 : index
    %c0_19 = arith.constant 0 : index
    %31 = vector.load %arg6[%c0_18, %c0_19] : memref<4x32xf32, #tpu.memory_space<vmem>>, vector<1x32xf32>
    %32 = vector.broadcast %31 : vector<1x32xf32> to vector<16x32xf32>
    %33 = arith.addf %30, %32 : vector<16x32xf32>
    %c1 = arith.constant 1 : index
    %c0_20 = arith.constant 0 : index
    %c0_21 = arith.constant 0 : index
    %34 = vector.load %arg4[%c1, %c0_20, %c0_21] : memref<3x32x32xf32, #tpu.memory_space<vmem>>, vector<1x32x32xf32>
    %35 = vector.shape_cast %34 : vector<1x32x32xf32> to vector<32x32xf32>
    %cst_22 = arith.constant dense<0.000000e+00> : vector<16x32xf32>
    %36 = tpu.matmul %11, %35, %cst_22 {dimension_numbers = #tpu.dot_dimension_numbers<[1], [0], [0], [1], [0, 0, 1, 1], [], []>} : vector<16x32xf32>, vector<32x32xf32>, vector<16x32xf32> -> vector<16x32xf32>
    %c1_23 = arith.constant 1 : index
    %c0_24 = arith.constant 0 : index
    %37 = vector.load %arg6[%c1_23, %c0_24] : memref<4x32xf32, #tpu.memory_space<vmem>>, vector<1x32xf32>
    %38 = vector.broadcast %37 : vector<1x32xf32> to vector<16x32xf32>
    %39 = arith.addf %36, %38 : vector<16x32xf32>
    %c2 = arith.constant 2 : index
    %c0_25 = arith.constant 0 : index
    %c0_26 = arith.constant 0 : index
    %40 = vector.load %arg4[%c2, %c0_25, %c0_26] : memref<3x32x32xf32, #tpu.memory_space<vmem>>, vector<1x32x32xf32>
    %41 = vector.shape_cast %40 : vector<1x32x32xf32> to vector<32x32xf32>
    %cst_27 = arith.constant dense<0.000000e+00> : vector<16x32xf32>
    %42 = tpu.matmul %11, %41, %cst_27 {dimension_numbers = #tpu.dot_dimension_numbers<[1], [0], [0], [1], [0, 0, 1, 1], [], []>} : vector<16x32xf32>, vector<32x32xf32>, vector<16x32xf32> -> vector<16x32xf32>
    %c2_28 = arith.constant 2 : index
    %c0_29 = arith.constant 0 : index
    %43 = vector.load %arg6[%c2_28, %c0_29] : memref<4x32xf32, #tpu.memory_space<vmem>>, vector<1x32xf32>
    %44 = vector.broadcast %43 : vector<1x32xf32> to vector<16x32xf32>
    %45 = arith.addf %42, %44 : vector<16x32xf32>
    %c0_30 = arith.constant 0 : index
    %c0_31 = arith.constant 0 : index
    %c0_32 = arith.constant 0 : index
    %46 = vector.load %arg5[%c0_30, %c0_31, %c0_32] : memref<3x32x32xf32, #tpu.memory_space<vmem>>, vector<1x32x32xf32>
    %47 = vector.shape_cast %46 : vector<1x32x32xf32> to vector<32x32xf32>
    %c1_33 = arith.constant 1 : index
    %c0_34 = arith.constant 0 : index
    %c0_35 = arith.constant 0 : index
    %48 = vector.load %arg5[%c1_33, %c0_34, %c0_35] : memref<3x32x32xf32, #tpu.memory_space<vmem>>, vector<1x32x32xf32>
    %49 = vector.shape_cast %48 : vector<1x32x32xf32> to vector<32x32xf32>
    %c2_36 = arith.constant 2 : index
    %c0_37 = arith.constant 0 : index
    %c0_38 = arith.constant 0 : index
    %50 = vector.load %arg5[%c2_36, %c0_37, %c0_38] : memref<3x32x32xf32, #tpu.memory_space<vmem>>, vector<1x32x32xf32>
    %51 = vector.shape_cast %50 : vector<1x32x32xf32> to vector<32x32xf32>
    %c3 = arith.constant 3 : index
    %c0_39 = arith.constant 0 : index
    %52 = vector.load %arg6[%c3, %c0_39] : memref<4x32xf32, #tpu.memory_space<vmem>>, vector<1x32xf32>
    %53 = vector.shape_cast %52 : vector<1x32xf32> to vector<1x32xf32>
    %54 = vector.broadcast %53 : vector<1x32xf32> to vector<2x32xf32>
    %c0_40 = arith.constant 0 : index
    %c0_41 = arith.constant 0 : index
    %55 = vector.load %arg9[%c0_40, %c0_41] : memref<2x32xf32, #tpu.memory_space<vmem>>, vector<2x32xf32>
    %56 = vector.extract_strided_slice %33 {offsets = [0, 0], sizes = [2, 32], strides = [1, 1]} : vector<16x32xf32> to vector<2x32xf32>
    %57 = vector.extract_strided_slice %39 {offsets = [0, 0], sizes = [2, 32], strides = [1, 1]} : vector<16x32xf32> to vector<2x32xf32>
    %58 = vector.extract_strided_slice %45 {offsets = [0, 0], sizes = [2, 32], strides = [1, 1]} : vector<16x32xf32> to vector<2x32xf32>
    %cst_42 = arith.constant dense<0.000000e+00> : vector<2x32xf32>
    %59 = tpu.matmul %55, %47, %cst_42 {dimension_numbers = #tpu.dot_dimension_numbers<[1], [0], [0], [1], [0, 0, 1, 1], [], []>} : vector<2x32xf32>, vector<32x32xf32>, vector<2x32xf32> -> vector<2x32xf32>
    %cst_43 = arith.constant dense<0.000000e+00> : vector<2x32xf32>
    %60 = tpu.matmul %55, %49, %cst_43 {dimension_numbers = #tpu.dot_dimension_numbers<[1], [0], [0], [1], [0, 0, 1, 1], [], []>} : vector<2x32xf32>, vector<32x32xf32>, vector<2x32xf32> -> vector<2x32xf32>
    %cst_44 = arith.constant dense<0.000000e+00> : vector<2x32xf32>
    %61 = tpu.matmul %55, %51, %cst_44 {dimension_numbers = #tpu.dot_dimension_numbers<[1], [0], [0], [1], [0, 0, 1, 1], [], []>} : vector<2x32xf32>, vector<32x32xf32>, vector<2x32xf32> -> vector<2x32xf32>
    %62 = arith.addf %56, %59 : vector<2x32xf32>
    %63 = arith.negf %62 : vector<2x32xf32>
    %64 = math.exp %63 : vector<2x32xf32>
    %cst_45 = arith.constant 1.000000e+00 : f32
    %65 = vector.broadcast %cst_45 : f32 to vector<2x32xf32>
    %66 = arith.addf %65, %64 : vector<2x32xf32>
    %67 = arith.divf %65, %66 : vector<2x32xf32>
    %68 = arith.addf %57, %60 : vector<2x32xf32>
    %69 = arith.negf %68 : vector<2x32xf32>
    %70 = math.exp %69 : vector<2x32xf32>
    %cst_46 = arith.constant 1.000000e+00 : f32
    %71 = vector.broadcast %cst_46 : f32 to vector<2x32xf32>
    %72 = arith.addf %71, %70 : vector<2x32xf32>
    %73 = arith.divf %71, %72 : vector<2x32xf32>
    %74 = arith.addf %61, %54 : vector<2x32xf32>
    %75 = arith.mulf %67, %74 : vector<2x32xf32>
    %76 = arith.addf %58, %75 : vector<2x32xf32>
    %77 = math.tanh %76 : vector<2x32xf32>
    %cst_47 = arith.constant 1.000000e+00 : f32
    %78 = vector.broadcast %cst_47 : f32 to vector<2x32xf32>
    %79 = arith.subf %78, %73 : vector<2x32xf32>
    %80 = arith.mulf %79, %77 : vector<2x32xf32>
    %81 = arith.mulf %73, %55 : vector<2x32xf32>
    %82 = arith.addf %80, %81 : vector<2x32xf32>
    %83 = vector.extract_strided_slice %33 {offsets = [2, 0], sizes = [2, 32], strides = [1, 1]} : vector<16x32xf32> to vector<2x32xf32>
    %84 = vector.extract_strided_slice %39 {offsets = [2, 0], sizes = [2, 32], strides = [1, 1]} : vector<16x32xf32> to vector<2x32xf32>
    %85 = vector.extract_strided_slice %45 {offsets = [2, 0], sizes = [2, 32], strides = [1, 1]} : vector<16x32xf32> to vector<2x32xf32>
    %cst_48 = arith.constant dense<0.000000e+00> : vector<2x32xf32>
    %86 = tpu.matmul %82, %47, %cst_48 {dimension_numbers = #tpu.dot_dimension_numbers<[1], [0], [0], [1], [0, 0, 1, 1], [], []>} : vector<2x32xf32>, vector<32x32xf32>, vector<2x32xf32> -> vector<2x32xf32>
    %cst_49 = arith.constant dense<0.000000e+00> : vector<2x32xf32>
    %87 = tpu.matmul %82, %49, %cst_49 {dimension_numbers = #tpu.dot_dimension_numbers<[1], [0], [0], [1], [0, 0, 1, 1], [], []>} : vector<2x32xf32>, vector<32x32xf32>, vector<2x32xf32> -> vector<2x32xf32>
    %cst_50 = arith.constant dense<0.000000e+00> : vector<2x32xf32>
    %88 = tpu.matmul %82, %51, %cst_50 {dimension_numbers = #tpu.dot_dimension_numbers<[1], [0], [0], [1], [0, 0, 1, 1], [], []>} : vector<2x32xf32>, vector<32x32xf32>, vector<2x32xf32> -> vector<2x32xf32>
    %89 = arith.addf %83, %86 : vector<2x32xf32>
    %90 = arith.negf %89 : vector<2x32xf32>
    %91 = math.exp %90 : vector<2x32xf32>
    %cst_51 = arith.constant 1.000000e+00 : f32
    %92 = vector.broadcast %cst_51 : f32 to vector<2x32xf32>
    %93 = arith.addf %92, %91 : vector<2x32xf32>
    %94 = arith.divf %92, %93 : vector<2x32xf32>
    %95 = arith.addf %84, %87 : vector<2x32xf32>
    %96 = arith.negf %95 : vector<2x32xf32>
    %97 = math.exp %96 : vector<2x32xf32>
    %cst_52 = arith.constant 1.000000e+00 : f32
    %98 = vector.broadcast %cst_52 : f32 to vector<2x32xf32>
    %99 = arith.addf %98, %97 : vector<2x32xf32>
    %100 = arith.divf %98, %99 : vector<2x32xf32>
    %101 = arith.addf %88, %54 : vector<2x32xf32>
    %102 = arith.mulf %94, %101 : vector<2x32xf32>
    %103 = arith.addf %85, %102 : vector<2x32xf32>
    %104 = math.tanh %103 : vector<2x32xf32>
    %cst_53 = arith.constant 1.000000e+00 : f32
    %105 = vector.broadcast %cst_53 : f32 to vector<2x32xf32>
    %106 = arith.subf %105, %100 : vector<2x32xf32>
    %107 = arith.mulf %106, %104 : vector<2x32xf32>
    %108 = arith.mulf %100, %82 : vector<2x32xf32>
    %109 = arith.addf %107, %108 : vector<2x32xf32>
    %110 = vector.extract_strided_slice %33 {offsets = [4, 0], sizes = [2, 32], strides = [1, 1]} : vector<16x32xf32> to vector<2x32xf32>
    %111 = vector.extract_strided_slice %39 {offsets = [4, 0], sizes = [2, 32], strides = [1, 1]} : vector<16x32xf32> to vector<2x32xf32>
    %112 = vector.extract_strided_slice %45 {offsets = [4, 0], sizes = [2, 32], strides = [1, 1]} : vector<16x32xf32> to vector<2x32xf32>
    %cst_54 = arith.constant dense<0.000000e+00> : vector<2x32xf32>
    %113 = tpu.matmul %109, %47, %cst_54 {dimension_numbers = #tpu.dot_dimension_numbers<[1], [0], [0], [1], [0, 0, 1, 1], [], []>} : vector<2x32xf32>, vector<32x32xf32>, vector<2x32xf32> -> vector<2x32xf32>
    %cst_55 = arith.constant dense<0.000000e+00> : vector<2x32xf32>
    %114 = tpu.matmul %109, %49, %cst_55 {dimension_numbers = #tpu.dot_dimension_numbers<[1], [0], [0], [1], [0, 0, 1, 1], [], []>} : vector<2x32xf32>, vector<32x32xf32>, vector<2x32xf32> -> vector<2x32xf32>
    %cst_56 = arith.constant dense<0.000000e+00> : vector<2x32xf32>
    %115 = tpu.matmul %109, %51, %cst_56 {dimension_numbers = #tpu.dot_dimension_numbers<[1], [0], [0], [1], [0, 0, 1, 1], [], []>} : vector<2x32xf32>, vector<32x32xf32>, vector<2x32xf32> -> vector<2x32xf32>
    %116 = arith.addf %110, %113 : vector<2x32xf32>
    %117 = arith.negf %116 : vector<2x32xf32>
    %118 = math.exp %117 : vector<2x32xf32>
    %cst_57 = arith.constant 1.000000e+00 : f32
    %119 = vector.broadcast %cst_57 : f32 to vector<2x32xf32>
    %120 = arith.addf %119, %118 : vector<2x32xf32>
    %121 = arith.divf %119, %120 : vector<2x32xf32>
    %122 = arith.addf %111, %114 : vector<2x32xf32>
    %123 = arith.negf %122 : vector<2x32xf32>
    %124 = math.exp %123 : vector<2x32xf32>
    %cst_58 = arith.constant 1.000000e+00 : f32
    %125 = vector.broadcast %cst_58 : f32 to vector<2x32xf32>
    %126 = arith.addf %125, %124 : vector<2x32xf32>
    %127 = arith.divf %125, %126 : vector<2x32xf32>
    %128 = arith.addf %115, %54 : vector<2x32xf32>
    %129 = arith.mulf %121, %128 : vector<2x32xf32>
    %130 = arith.addf %112, %129 : vector<2x32xf32>
    %131 = math.tanh %130 : vector<2x32xf32>
    %cst_59 = arith.constant 1.000000e+00 : f32
    %132 = vector.broadcast %cst_59 : f32 to vector<2x32xf32>
    %133 = arith.subf %132, %127 : vector<2x32xf32>
    %134 = arith.mulf %133, %131 : vector<2x32xf32>
    %135 = arith.mulf %127, %109 : vector<2x32xf32>
    %136 = arith.addf %134, %135 : vector<2x32xf32>
    %137 = vector.extract_strided_slice %33 {offsets = [6, 0], sizes = [2, 32], strides = [1, 1]} : vector<16x32xf32> to vector<2x32xf32>
    %138 = vector.extract_strided_slice %39 {offsets = [6, 0], sizes = [2, 32], strides = [1, 1]} : vector<16x32xf32> to vector<2x32xf32>
    %139 = vector.extract_strided_slice %45 {offsets = [6, 0], sizes = [2, 32], strides = [1, 1]} : vector<16x32xf32> to vector<2x32xf32>
    %cst_60 = arith.constant dense<0.000000e+00> : vector<2x32xf32>
    %140 = tpu.matmul %136, %47, %cst_60 {dimension_numbers = #tpu.dot_dimension_numbers<[1], [0], [0], [1], [0, 0, 1, 1], [], []>} : vector<2x32xf32>, vector<32x32xf32>, vector<2x32xf32> -> vector<2x32xf32>
    %cst_61 = arith.constant dense<0.000000e+00> : vector<2x32xf32>
    %141 = tpu.matmul %136, %49, %cst_61 {dimension_numbers = #tpu.dot_dimension_numbers<[1], [0], [0], [1], [0, 0, 1, 1], [], []>} : vector<2x32xf32>, vector<32x32xf32>, vector<2x32xf32> -> vector<2x32xf32>
    %cst_62 = arith.constant dense<0.000000e+00> : vector<2x32xf32>
    %142 = tpu.matmul %136, %51, %cst_62 {dimension_numbers = #tpu.dot_dimension_numbers<[1], [0], [0], [1], [0, 0, 1, 1], [], []>} : vector<2x32xf32>, vector<32x32xf32>, vector<2x32xf32> -> vector<2x32xf32>
    %143 = arith.addf %137, %140 : vector<2x32xf32>
    %144 = arith.negf %143 : vector<2x32xf32>
    %145 = math.exp %144 : vector<2x32xf32>
    %cst_63 = arith.constant 1.000000e+00 : f32
    %146 = vector.broadcast %cst_63 : f32 to vector<2x32xf32>
    %147 = arith.addf %146, %145 : vector<2x32xf32>
    %148 = arith.divf %146, %147 : vector<2x32xf32>
    %149 = arith.addf %138, %141 : vector<2x32xf32>
    %150 = arith.negf %149 : vector<2x32xf32>
    %151 = math.exp %150 : vector<2x32xf32>
    %cst_64 = arith.constant 1.000000e+00 : f32
    %152 = vector.broadcast %cst_64 : f32 to vector<2x32xf32>
    %153 = arith.addf %152, %151 : vector<2x32xf32>
    %154 = arith.divf %152, %153 : vector<2x32xf32>
    %155 = arith.addf %142, %54 : vector<2x32xf32>
    %156 = arith.mulf %148, %155 : vector<2x32xf32>
    %157 = arith.addf %139, %156 : vector<2x32xf32>
    %158 = math.tanh %157 : vector<2x32xf32>
    %cst_65 = arith.constant 1.000000e+00 : f32
    %159 = vector.broadcast %cst_65 : f32 to vector<2x32xf32>
    %160 = arith.subf %159, %154 : vector<2x32xf32>
    %161 = arith.mulf %160, %158 : vector<2x32xf32>
    %162 = arith.mulf %154, %136 : vector<2x32xf32>
    %163 = arith.addf %161, %162 : vector<2x32xf32>
    %164 = vector.extract_strided_slice %33 {offsets = [8, 0], sizes = [2, 32], strides = [1, 1]} : vector<16x32xf32> to vector<2x32xf32>
    %165 = vector.extract_strided_slice %39 {offsets = [8, 0], sizes = [2, 32], strides = [1, 1]} : vector<16x32xf32> to vector<2x32xf32>
    %166 = vector.extract_strided_slice %45 {offsets = [8, 0], sizes = [2, 32], strides = [1, 1]} : vector<16x32xf32> to vector<2x32xf32>
    %cst_66 = arith.constant dense<0.000000e+00> : vector<2x32xf32>
    %167 = tpu.matmul %163, %47, %cst_66 {dimension_numbers = #tpu.dot_dimension_numbers<[1], [0], [0], [1], [0, 0, 1, 1], [], []>} : vector<2x32xf32>, vector<32x32xf32>, vector<2x32xf32> -> vector<2x32xf32>
    %cst_67 = arith.constant dense<0.000000e+00> : vector<2x32xf32>
    %168 = tpu.matmul %163, %49, %cst_67 {dimension_numbers = #tpu.dot_dimension_numbers<[1], [0], [0], [1], [0, 0, 1, 1], [], []>} : vector<2x32xf32>, vector<32x32xf32>, vector<2x32xf32> -> vector<2x32xf32>
    %cst_68 = arith.constant dense<0.000000e+00> : vector<2x32xf32>
    %169 = tpu.matmul %163, %51, %cst_68 {dimension_numbers = #tpu.dot_dimension_numbers<[1], [0], [0], [1], [0, 0, 1, 1], [], []>} : vector<2x32xf32>, vector<32x32xf32>, vector<2x32xf32> -> vector<2x32xf32>
    %170 = arith.addf %164, %167 : vector<2x32xf32>
    %171 = arith.negf %170 : vector<2x32xf32>
    %172 = math.exp %171 : vector<2x32xf32>
    %cst_69 = arith.constant 1.000000e+00 : f32
    %173 = vector.broadcast %cst_69 : f32 to vector<2x32xf32>
    %174 = arith.addf %173, %172 : vector<2x32xf32>
    %175 = arith.divf %173, %174 : vector<2x32xf32>
    %176 = arith.addf %165, %168 : vector<2x32xf32>
    %177 = arith.negf %176 : vector<2x32xf32>
    %178 = math.exp %177 : vector<2x32xf32>
    %cst_70 = arith.constant 1.000000e+00 : f32
    %179 = vector.broadcast %cst_70 : f32 to vector<2x32xf32>
    %180 = arith.addf %179, %178 : vector<2x32xf32>
    %181 = arith.divf %179, %180 : vector<2x32xf32>
    %182 = arith.addf %169, %54 : vector<2x32xf32>
    %183 = arith.mulf %175, %182 : vector<2x32xf32>
    %184 = arith.addf %166, %183 : vector<2x32xf32>
    %185 = math.tanh %184 : vector<2x32xf32>
    %cst_71 = arith.constant 1.000000e+00 : f32
    %186 = vector.broadcast %cst_71 : f32 to vector<2x32xf32>
    %187 = arith.subf %186, %181 : vector<2x32xf32>
    %188 = arith.mulf %187, %185 : vector<2x32xf32>
    %189 = arith.mulf %181, %163 : vector<2x32xf32>
    %190 = arith.addf %188, %189 : vector<2x32xf32>
    %191 = vector.extract_strided_slice %33 {offsets = [10, 0], sizes = [2, 32], strides = [1, 1]} : vector<16x32xf32> to vector<2x32xf32>
    %192 = vector.extract_strided_slice %39 {offsets = [10, 0], sizes = [2, 32], strides = [1, 1]} : vector<16x32xf32> to vector<2x32xf32>
    %193 = vector.extract_strided_slice %45 {offsets = [10, 0], sizes = [2, 32], strides = [1, 1]} : vector<16x32xf32> to vector<2x32xf32>
    %cst_72 = arith.constant dense<0.000000e+00> : vector<2x32xf32>
    %194 = tpu.matmul %190, %47, %cst_72 {dimension_numbers = #tpu.dot_dimension_numbers<[1], [0], [0], [1], [0, 0, 1, 1], [], []>} : vector<2x32xf32>, vector<32x32xf32>, vector<2x32xf32> -> vector<2x32xf32>
    %cst_73 = arith.constant dense<0.000000e+00> : vector<2x32xf32>
    %195 = tpu.matmul %190, %49, %cst_73 {dimension_numbers = #tpu.dot_dimension_numbers<[1], [0], [0], [1], [0, 0, 1, 1], [], []>} : vector<2x32xf32>, vector<32x32xf32>, vector<2x32xf32> -> vector<2x32xf32>
    %cst_74 = arith.constant dense<0.000000e+00> : vector<2x32xf32>
    %196 = tpu.matmul %190, %51, %cst_74 {dimension_numbers = #tpu.dot_dimension_numbers<[1], [0], [0], [1], [0, 0, 1, 1], [], []>} : vector<2x32xf32>, vector<32x32xf32>, vector<2x32xf32> -> vector<2x32xf32>
    %197 = arith.addf %191, %194 : vector<2x32xf32>
    %198 = arith.negf %197 : vector<2x32xf32>
    %199 = math.exp %198 : vector<2x32xf32>
    %cst_75 = arith.constant 1.000000e+00 : f32
    %200 = vector.broadcast %cst_75 : f32 to vector<2x32xf32>
    %201 = arith.addf %200, %199 : vector<2x32xf32>
    %202 = arith.divf %200, %201 : vector<2x32xf32>
    %203 = arith.addf %192, %195 : vector<2x32xf32>
    %204 = arith.negf %203 : vector<2x32xf32>
    %205 = math.exp %204 : vector<2x32xf32>
    %cst_76 = arith.constant 1.000000e+00 : f32
    %206 = vector.broadcast %cst_76 : f32 to vector<2x32xf32>
    %207 = arith.addf %206, %205 : vector<2x32xf32>
    %208 = arith.divf %206, %207 : vector<2x32xf32>
    %209 = arith.addf %196, %54 : vector<2x32xf32>
    %210 = arith.mulf %202, %209 : vector<2x32xf32>
    %211 = arith.addf %193, %210 : vector<2x32xf32>
    %212 = math.tanh %211 : vector<2x32xf32>
    %cst_77 = arith.constant 1.000000e+00 : f32
    %213 = vector.broadcast %cst_77 : f32 to vector<2x32xf32>
    %214 = arith.subf %213, %208 : vector<2x32xf32>
    %215 = arith.mulf %214, %212 : vector<2x32xf32>
    %216 = arith.mulf %208, %190 : vector<2x32xf32>
    %217 = arith.addf %215, %216 : vector<2x32xf32>
    %218 = vector.extract_strided_slice %33 {offsets = [12, 0], sizes = [2, 32], strides = [1, 1]} : vector<16x32xf32> to vector<2x32xf32>
    %219 = vector.extract_strided_slice %39 {offsets = [12, 0], sizes = [2, 32], strides = [1, 1]} : vector<16x32xf32> to vector<2x32xf32>
    %220 = vector.extract_strided_slice %45 {offsets = [12, 0], sizes = [2, 32], strides = [1, 1]} : vector<16x32xf32> to vector<2x32xf32>
    %cst_78 = arith.constant dense<0.000000e+00> : vector<2x32xf32>
    %221 = tpu.matmul %217, %47, %cst_78 {dimension_numbers = #tpu.dot_dimension_numbers<[1], [0], [0], [1], [0, 0, 1, 1], [], []>} : vector<2x32xf32>, vector<32x32xf32>, vector<2x32xf32> -> vector<2x32xf32>
    %cst_79 = arith.constant dense<0.000000e+00> : vector<2x32xf32>
    %222 = tpu.matmul %217, %49, %cst_79 {dimension_numbers = #tpu.dot_dimension_numbers<[1], [0], [0], [1], [0, 0, 1, 1], [], []>} : vector<2x32xf32>, vector<32x32xf32>, vector<2x32xf32> -> vector<2x32xf32>
    %cst_80 = arith.constant dense<0.000000e+00> : vector<2x32xf32>
    %223 = tpu.matmul %217, %51, %cst_80 {dimension_numbers = #tpu.dot_dimension_numbers<[1], [0], [0], [1], [0, 0, 1, 1], [], []>} : vector<2x32xf32>, vector<32x32xf32>, vector<2x32xf32> -> vector<2x32xf32>
    %224 = arith.addf %218, %221 : vector<2x32xf32>
    %225 = arith.negf %224 : vector<2x32xf32>
    %226 = math.exp %225 : vector<2x32xf32>
    %cst_81 = arith.constant 1.000000e+00 : f32
    %227 = vector.broadcast %cst_81 : f32 to vector<2x32xf32>
    %228 = arith.addf %227, %226 : vector<2x32xf32>
    %229 = arith.divf %227, %228 : vector<2x32xf32>
    %230 = arith.addf %219, %222 : vector<2x32xf32>
    %231 = arith.negf %230 : vector<2x32xf32>
    %232 = math.exp %231 : vector<2x32xf32>
    %cst_82 = arith.constant 1.000000e+00 : f32
    %233 = vector.broadcast %cst_82 : f32 to vector<2x32xf32>
    %234 = arith.addf %233, %232 : vector<2x32xf32>
    %235 = arith.divf %233, %234 : vector<2x32xf32>
    %236 = arith.addf %223, %54 : vector<2x32xf32>
    %237 = arith.mulf %229, %236 : vector<2x32xf32>
    %238 = arith.addf %220, %237 : vector<2x32xf32>
    %239 = math.tanh %238 : vector<2x32xf32>
    %cst_83 = arith.constant 1.000000e+00 : f32
    %240 = vector.broadcast %cst_83 : f32 to vector<2x32xf32>
    %241 = arith.subf %240, %235 : vector<2x32xf32>
    %242 = arith.mulf %241, %239 : vector<2x32xf32>
    %243 = arith.mulf %235, %217 : vector<2x32xf32>
    %244 = arith.addf %242, %243 : vector<2x32xf32>
    %245 = vector.extract_strided_slice %33 {offsets = [14, 0], sizes = [2, 32], strides = [1, 1]} : vector<16x32xf32> to vector<2x32xf32>
    %246 = vector.extract_strided_slice %39 {offsets = [14, 0], sizes = [2, 32], strides = [1, 1]} : vector<16x32xf32> to vector<2x32xf32>
    %247 = vector.extract_strided_slice %45 {offsets = [14, 0], sizes = [2, 32], strides = [1, 1]} : vector<16x32xf32> to vector<2x32xf32>
    %cst_84 = arith.constant dense<0.000000e+00> : vector<2x32xf32>
    %248 = tpu.matmul %244, %47, %cst_84 {dimension_numbers = #tpu.dot_dimension_numbers<[1], [0], [0], [1], [0, 0, 1, 1], [], []>} : vector<2x32xf32>, vector<32x32xf32>, vector<2x32xf32> -> vector<2x32xf32>
    %cst_85 = arith.constant dense<0.000000e+00> : vector<2x32xf32>
    %249 = tpu.matmul %244, %49, %cst_85 {dimension_numbers = #tpu.dot_dimension_numbers<[1], [0], [0], [1], [0, 0, 1, 1], [], []>} : vector<2x32xf32>, vector<32x32xf32>, vector<2x32xf32> -> vector<2x32xf32>
    %cst_86 = arith.constant dense<0.000000e+00> : vector<2x32xf32>
    %250 = tpu.matmul %244, %51, %cst_86 {dimension_numbers = #tpu.dot_dimension_numbers<[1], [0], [0], [1], [0, 0, 1, 1], [], []>} : vector<2x32xf32>, vector<32x32xf32>, vector<2x32xf32> -> vector<2x32xf32>
    %251 = arith.addf %245, %248 : vector<2x32xf32>
    %252 = arith.negf %251 : vector<2x32xf32>
    %253 = math.exp %252 : vector<2x32xf32>
    %cst_87 = arith.constant 1.000000e+00 : f32
    %254 = vector.broadcast %cst_87 : f32 to vector<2x32xf32>
    %255 = arith.addf %254, %253 : vector<2x32xf32>
    %256 = arith.divf %254, %255 : vector<2x32xf32>
    %257 = arith.addf %246, %249 : vector<2x32xf32>
    %258 = arith.negf %257 : vector<2x32xf32>
    %259 = math.exp %258 : vector<2x32xf32>
    %cst_88 = arith.constant 1.000000e+00 : f32
    %260 = vector.broadcast %cst_88 : f32 to vector<2x32xf32>
    %261 = arith.addf %260, %259 : vector<2x32xf32>
    %262 = arith.divf %260, %261 : vector<2x32xf32>
    %263 = arith.addf %250, %54 : vector<2x32xf32>
    %264 = arith.mulf %256, %263 : vector<2x32xf32>
    %265 = arith.addf %247, %264 : vector<2x32xf32>
    %266 = math.tanh %265 : vector<2x32xf32>
    %cst_89 = arith.constant 1.000000e+00 : f32
    %267 = vector.broadcast %cst_89 : f32 to vector<2x32xf32>
    %268 = arith.subf %267, %262 : vector<2x32xf32>
    %269 = arith.mulf %268, %266 : vector<2x32xf32>
    %270 = arith.mulf %262, %244 : vector<2x32xf32>
    %271 = arith.addf %269, %270 : vector<2x32xf32>
    %c0_90 = arith.constant 0 : index
    %c0_91 = arith.constant 0 : index
    %272 = vector.load %arg9[%c0_90, %c0_91] : memref<2x32xf32, #tpu.memory_space<vmem>>, vector<2x32xf32>
    tpu.vector_store %arg9[%c0_90, %c0_91], %271 {strides = array<i32>} : memref<2x32xf32, #tpu.memory_space<vmem>>, vector<2x32xf32>,
    return
  }
  func.func @transform_0(%arg0: i32, %arg1: i32) -> (i32, i32, i32) {
    %c0_i32 = arith.constant 0 : i32
    %c0_i32_0 = arith.constant 0 : i32
    return %arg1, %arg0, %c0_i32 : i32, i32, i32
  }
  func.func @transform_1(%arg0: i32, %arg1: i32) -> (i32, i32) {
    %c0_i32 = arith.constant 0 : i32
    %c0_i32_0 = arith.constant 0 : i32
    %c0_i32_1 = arith.constant 0 : i32
    return %c0_i32, %c0_i32_0 : i32, i32
  }
  func.func @transform_2(%arg0: i32, %arg1: i32) -> (i32, i32, i32) {
    %c0_i32 = arith.constant 0 : i32
    %c0_i32_0 = arith.constant 0 : i32
    %c0_i32_1 = arith.constant 0 : i32
    %c0_i32_2 = arith.constant 0 : i32
    return %c0_i32, %c0_i32_0, %c0_i32_1 : i32, i32, i32
  }
  func.func @transform_3(%arg0: i32, %arg1: i32) -> (i32, i32, i32) {
    %c0_i32 = arith.constant 0 : i32
    %c0_i32_0 = arith.constant 0 : i32
    %c0_i32_1 = arith.constant 0 : i32
    %c0_i32_2 = arith.constant 0 : i32
    return %c0_i32, %c0_i32_0, %c0_i32_1 : i32, i32, i32
  }
  func.func @transform_4(%arg0: i32, %arg1: i32) -> (i32, i32) {
    %c0_i32 = arith.constant 0 : i32
    %c0_i32_0 = arith.constant 0 : i32
    %c0_i32_1 = arith.constant 0 : i32
    return %c0_i32, %c0_i32_0 : i32, i32
  }
  func.func @transform_5(%arg0: i32, %arg1: i32) -> (i32, i32) {
    %c0_i32 = arith.constant 0 : i32
    %c0_i32_0 = arith.constant 0 : i32
    return %arg0, %c0_i32 : i32, i32
  }
  func.func @transform_6(%arg0: i32, %arg1: i32) -> (i32, i32) {
    %c0_i32 = arith.constant 0 : i32
    return %arg0, %arg1 : i32, i32
  }
  func.func @transform_7(%arg0: i32, %arg1: i32) -> (i32, i32) {
    %c0_i32 = arith.constant 0 : i32
    %c0_i32_0 = arith.constant 0 : i32
    return %arg0, %c0_i32 : i32, i32
  }
}

</mosaic_0001>

<bundles_post_ra>
// kernel: tpu_custom_call.1
= control target key start
LH: loop header
LB: loop body
LE: loop exit
PB: predicated region body
PF: predicated region fallthrough
CT: control target
= control target key end

     0   :  { %13 = vsyncpa [#allocation6], 0  ;;  %s1990_s0 = inlined_call_operand.vmem [shape: s32[8,2,1], index: 0, kind: input, shape index: {}]   ;;  %s1991_s1 = inlined_call_operand.hbm [shape: f32[20,32], index: 1, kind: input, shape index: {}]   ;;  %s1992_s2 = inlined_call_operand.hbm [shape: f32[3,32,32], index: 2, kind: input, shape index: {}]   ;;  %s1993_s3 = inlined_call_operand.hbm [shape: f32[3,32,32], index: 3, kind: input, shape index: {}]   ;;  %s1994_s4 = inlined_call_operand.vmem [shape: f32[4,32], index: 4, kind: input, shape index: {}]   ;;  %s1995_s5 = inlined_call_operand.vmem [shape: f32[2,32], index: 5, kind: input, shape index: {}]   ;;  %s1996_s6 = inlined_call_operand.hbm [shape: f32[2,256], index: 6, kind: output, shape index: {0}]   ;;  %s1997_s7 = inlined_call_operand.hbm [shape: f32[2,32], index: 7, kind: output, shape index: {1}]  }
   0x1   :  { %14 = vsyncpa [#allocation9], 0 }
   0x2   :  { %15 = vsyncpa [#allocation7], 0 }
   0x3   :  { %16 = vsyncpa [#allocation13], 0  ;;  %s36_s26 = sshll.u32 %s1992_s2, 4  ;;  %s1635_s27 = smov [#allocation8]   ;;  %s37_s26 = int_to_ptr.hbm [resolvable:$true] %s36_s26 }
   0x4   :  { %s38_s28 = sshll.u32 %s1635_s27, 4  ;;  %s23_s8 = sshll.u32 %s1991_s1, 4  ;;  %s39_s28 = int_to_ptr.vmem [resolvable:$true] %s38_s28  ;;  %s24_s8 = int_to_ptr.hbm [resolvable:$true] %s23_s8 }
   0x5   :  { %s1636_s9 = smov 128   ;;  %s1637_s10 = smov 8  }
   0x6   :  { %44 = dma.hbm_to_vmem [thread:$0]  %s37_s26, 1536, %s39_s28, [#allocation9], %s1636_s9, %s1636_s9, %s1637_s10  }
   0x7   :  { %s1638_s11 = smov [#allocation5]   ;;  %s49_s15 = sshll.u32 %s1993_s3, 4  ;;  %s50_s15 = int_to_ptr.hbm [resolvable:$true] %s49_s15 }
   0x8   :  { %s25_s12 = sshll.u32 %s1638_s11, 4  ;;  %s1639_s2 = smov [#allocation10]   ;;  %s26_s12 = int_to_ptr.vmem [resolvable:$true] %s25_s12 }
   0x9   :  { %31 = dma.hbm_to_vmem [thread:$0]  %s24_s8, 384, %s26_s12, [#allocation6], %s1636_s9, %s1636_s9, %s1637_s10  }
   0xa   :  { %s51_s16 = sshll.u32 %s1639_s2, 4  ;;  %s52_s16 = int_to_ptr.vmem [resolvable:$true] %s51_s16 }
   0xb   :  { %57 = dma.hbm_to_vmem [thread:$0]  %s50_s15, 1536, %s52_s16, [#allocation9], %s1636_s9, %s1636_s9, %s1637_s10  }
   0xc   :  { %1627 = dma.done.wait [#allocation6], 384  }
   0xd   :  { %1628 = vsyncadd [#allocation6], 4294966912 }
   0xe   :  { %1629 = dma.done.wait [#allocation9], 3072  }
   0xf   :  { %1630 = vsyncadd [#allocation9], 4294964224  ;;  %v1640_v0 = vmov 0   ;;  %v83_v1 = vld [vmem:[%s1990_s0 + $0x4] sm:$0x3]  ;;  %vm180_vm0 = vcmask 1043456   ;;  %v89_v38 = vlaneseq }
  0x10   :  { %1421 = vset.pattern.permute.xlu1 %v1640_v0  ;;  %1420 = vset.pattern.permute.xlu0 %v1640_v0  ;;  %v81_v2 = vld [vmem:[%s1990_s0] sm:$0x3]  ;;  %v85_v3 = vld [vmem:[%s1990_s0 + $0x8] sm:$0x3]  ;;  %v84_v4 = vld [vmem:[%s1990_s0 + $0x6] sm:$0x3] }
  0x11   :  { %1422 = vset.pattern.permute.xlu2 %v1640_v0  ;;  %106 = vperm.xlu1 %1421, %v83_v1   ;;  %v82_v5 = vld [vmem:[%s1990_s0 + $0x2] sm:$0x3]  ;;  %v86_v6 = vld [vmem:[%s1990_s0 + $0xa] sm:$0x3]  ;;  %v88_v7 = vld [vmem:[%s1990_s0 + $0xe] sm:$0x3] }
  0x12   :  { %92 = vperm.xlu0 %1420, %v81_v2   ;;  %120 = vperm.xlu2 %1422, %v85_v3   ;;  %v87_v8 = vld [vmem:[%s1990_s0 + $0xc] sm:$0x3]  ;;  %v1641_v9 = vmov 269488144   ;;  %v172_v14 = vld [vmem:[#allocation5 + $0x10] sm:$0xf] }
  0x13   :  { %v95_v10 = vunpack.c.l.s4 %v1641_v9  ;;  %1358 = vmatpush.msk.msra.mxu0 %vm180_vm0, %v172_v14  ;;  %v171_v16 = vld [vmem:[#allocation5 + $0x8] sm:$0xff]  ;;  %v170_v18 = vld [vmem:[#allocation5] sm:$0xff]  ;;  %v1721_v19 = vld [vmem:[#allocation10 + $0x18] sm:$0xff]  ;;  %v90_v41 = vand.u32 127, %v89_v38  ;;  %vm173_vm1 = vcmask 162816   ;;  %v1642_v45 = vmov 0.0  }
  0x14   :  { %v260_v20 = vld [vmem:[#allocation8 + $0x18] sm:$0xff]  ;;  %v259_v23 = vld [vmem:[#allocation8 + $0x10] sm:$0xff]  ;;  %v258_v29 = vld [vmem:[#allocation8 + $0x8] sm:$0xff]  ;;  %vm79_vm4 = vcmask 254976   ;;  %vm263_vm5 = vcmask 261120   ;;  %s1644_s9 = smov 64  }
  0x15   :  { %v96_v11 = vunpack.c.0.s8 %v95_v10  ;;  %198 = vmatpush.msra.mxu0 %v171_v16  ;;  %v295_v21 = vld [vmem:[#allocation8 + $0x38] sm:$0xff]  ;;  %280 = vmatpush.msra.mxu1 %v260_v20  ;;  %v294_v24 = vld [vmem:[#allocation8 + $0x30] sm:$0xff]  ;;  %v293_v32 = vld [vmem:[#allocation8 + $0x28] sm:$0xff]  ;;  %s1645_s10 = smov 96   ;;  %vm216_vm6 = vcmask 517376   ;;  %vm224_vm7 = vcmask 779776  }
  0x16   :  { %v325_v22 = vld [vmem:[#allocation8 + $0x58] sm:$0xff]  ;;  %310 = vmatpush.msra.mxu2 %v295_v21  ;;  %v324_v27 = vld [vmem:[#allocation8 + $0x50] sm:$0xff]  ;;  %v323_v33 = vld [vmem:[#allocation8 + $0x48] sm:$0xff]  ;;  %vm232_vm9 = vcmask 1042176   ;;  %s1329_s3 = sshll.u32 %s1996_s6, 4  ;;  %s1646_s18 = smov [#allocation11]   ;;  %s1330_s3 = int_to_ptr.hbm [resolvable:$true] %s1329_s3 }
  0x17   :  { %199 = vmatpush.msra.mxu0 %v170_v18  ;;  %340 = vmatpush.msra.mxu3 %v325_v22  ;;  %v1724_v28 = vld [vmem:[#allocation10 + $0x10] sm:$0xff]  ;;  %v78_v49 = vld [vmem:[%s1995_s5] sm:$0x3]  ;;  %v1731_v53 = vld [vmem:[#allocation10 + $0x8] sm:$0xff]  ;;  %s1643_s5 = smov 32   ;;  %s1327_s19 = sshll.u32 %s1646_s18, 4  ;;  %s1328_s19 = int_to_ptr.vmem [resolvable:$true] %s1327_s19 }
  0x18   :  { %281 = vmatpush.msra.mxu1 %v259_v23  ;;  %311 = vmatpush.msra.mxu2 %v294_v24  ;;  %80 = vst.msk [vmem:[#allocation12] sm:$0x3] %vm79_vm4, %v78_v49  ;;  %v257_v50 = vld [vmem:[#allocation8] sm:$0xff]  ;;  %v1734_v54 = vld [vmem:[#allocation10 + $0x38] sm:$0xff]  ;;  %v1738_v56 = vld [vmem:[#allocation10 + $0x30] sm:$0xff]  ;;  %s1647_s6 = smov [#allocation12]  }
  0x19   :  { %113 = vperm.xlu1 %1421, %v84_v4   ;;  %383 = vmatpush.msrb.mxu0 %v1721_v19  ;;  %v292_v51 = vld [vmem:[#allocation8 + $0x20] sm:$0xff]  ;;  %v1753_v58 = vld [vmem:[#allocation10 + $0x28] sm:$0xff]  ;;  %v1758_v60 = vld [vmem:[#allocation10 + $0x58] sm:$0xff]  ;;  %s1338_s20 = sshll.u32 %s1647_s6, 4  ;;  %s1340_s23 = sshll.u32 %s1997_s7, 4  ;;  %s1339_s20 = int_to_ptr.vmem [resolvable:$true] %s1338_s20  ;;  %s1341_s23 = int_to_ptr.hbm [resolvable:$true] %s1340_s23 }
  0x1a   :  { %99 = vperm.xlu0 %1420, %v82_v5   ;;  %127 = vperm.xlu2 %1422, %v86_v6   ;;  %v322_v52 = vld [vmem:[#allocation8 + $0x40] sm:$0xff]  ;;  %v1765_v61 = vld [vmem:[#allocation10 + $0x50] sm:$0xff]  ;;  %v1769_v62 = vld [vmem:[#allocation10 + $0x48] sm:$0xff] }
  0x1b   :  { %384 = vmatpush.msrb.mxu0 %v1724_v28  ;;  %341 = vmatpush.msra.mxu3 %v324_v27  ;;  %v1736_v55 = vld [vmem:[#allocation10] sm:$0xff] }
  0x1c   :  { %282 = vmatpush.msra.mxu1 %v258_v29  ;;  %312 = vmatpush.msra.mxu2 %v293_v32  ;;  %v1756_v59 = vld [vmem:[#allocation10 + $0x20] sm:$0xff] }
  0x1d   :  { %342 = vmatpush.msra.mxu3 %v323_v33  ;;  %385 = vmatpush.msrb.mxu0 %v1731_v53  ;;  %v1773_v63 = vld [vmem:[#allocation10 + $0x40] sm:$0xff] }
  0x1e   :  { %283 = vmatpush.msra.mxu1 %v257_v50  ;;  %313 = vmatpush.msra.mxu2 %v292_v51  ;;  %v1423_v9 = vld [vmem:[%s1994_s4] ss:$0 sm:$0xff]  ;;  %v1424_v20 = vld [vmem:[%s1994_s4 + $0x1] ss:$0 sm:$0xff] }
  0x1f   :  { %343 = vmatpush.msra.mxu3 %v322_v52  ;;  %386 = vmatpush.msrb.mxu0 %v1736_v55  ;;  %v1743_v57 = vld [vmem:[#allocation12] sm:$0x3] }
  0x20   :  { %403 = vmatpush.msrb.mxu1 %v1734_v54  ;;  %463 = vmatpush.msrb.mxu2 %v1758_v60 }
  0x21   :  { %141 = vperm.xlu1 %1421, %v88_v7   ;;  %493 = vmatpush.msrb.mxu3 %v1721_v19 }
  0x22   :  { %134 = vperm.xlu0 %1420, %v87_v8   ;;  %404 = vmatpush.msrb.mxu1 %v1738_v56 }
  0x23   :  { %494 = vmatpush.msrb.mxu3 %v1724_v28  ;;  %464 = vmatpush.msrb.mxu2 %v1765_v61 }
  0x24   :  { %405 = vmatpush.msrb.mxu1 %v1753_v58 }
  0x25   :  { %495 = vmatpush.msrb.mxu3 %v1731_v53  ;;  %465 = vmatpush.msrb.mxu2 %v1769_v62 }
  0x26   :  { %406 = vmatpush.msrb.mxu1 %v1756_v59 }
  0x27   :  { %496 = vmatpush.msrb.mxu3 %v1736_v55  ;;  %466 = vmatpush.msrb.mxu2 %v1773_v63 }
  0x6c   :  { %v121_v12 = vpop.permute.xlu2 %120 }
  0x6d   :  { %v125_v13 = vperm.slane %v121_v12, %v96_v11 }
  0x6f   :  { %155 = vst [vmem:[#allocation1 + $0x20] ss:$4 sm:$0xff] %v125_v13 }
  0x74   :  { %v128_v15 = vpop.permute.xlu2 %127 }
  0x75   :  { %v132_v17 = vperm.slane %v128_v15, %v96_v11 }
  0x77   :  { %157 = vst [vmem:[#allocation1 + $0x21] ss:$4 sm:$0xff] %v132_v17 }
  0x83   :  { %v107_v25 = vpop.permute.xlu1 %106 }
  0x84   :  { %v93_v26 = vpop.permute.xlu0 %92  ;;  %v111_v30 = vperm.slane %v107_v25, %v96_v11 }
  0x85   :  { %v97_v31 = vperm.slane %v93_v26, %v96_v11 }
  0x86   :  { %151 = vst [vmem:[#allocation1 + $0x2] ss:$4 sm:$0xff] %v111_v30 }
  0x87   :  { %147 = vst [vmem:[#allocation1] ss:$4 sm:$0xff] %v97_v31 }
  0x8b   :  { %v114_v34 = vpop.permute.xlu1 %113 }
  0x8c   :  { %v100_v35 = vpop.permute.xlu0 %99  ;;  %v118_v36 = vperm.slane %v114_v34, %v96_v11 }
  0x8d   :  { %v104_v37 = vperm.slane %v100_v35, %v96_v11  ;;  %v1832_v35 = vld [vmem:[%s1994_s4 + $0x3] ss:$0 sm:$0xff] }
  0x8e   :  { %153 = vst [vmem:[#allocation1 + $0x3] ss:$4 sm:$0xff] %v118_v36 }
  0x8f   :  { %149 = vst [vmem:[#allocation1 + $0x1] ss:$4 sm:$0xff] %v104_v37 }
  0x93   :  { %v142_v39 = vpop.permute.xlu1 %141 }
  0x94   :  { %v135_v40 = vpop.permute.xlu0 %134  ;;  %v146_v42 = vperm.slane %v142_v39, %v96_v11 }
  0x95   :  { %v139_v43 = vperm.slane %v135_v40, %v96_v11 }
  0x96   :  { %161 = vst [vmem:[#allocation1 + $0x23] ss:$4 sm:$0xff] %v146_v42  ;;  %v162_v44 = vld.sshfl [vmem:[#allocation1] sm:$0xff pattern:$0x73625140] }
  0x97   :  { %159 = vst [vmem:[#allocation1 + $0x22] ss:$4 sm:$0xff] %v139_v43  ;;  %vm164_vm2 = vcmp.eq.s32.totalorder %v90_v41, %v162_v44 }
  0x98   :  { %v1356_v46 = vsel %vm164_vm2, 1.0, %v1642_v45 }
  0x99   :  { %1359 = vmatmul.msk.f32.vlgmr.msra.gmra.mxu0 %vm173_vm1, %v1356_v46 }
  0x9a   :  { %513 = vmatpush.msra.mxu0 %v1734_v54 }
  0x9c   :  { %514 = vmatpush.msra.mxu0 %v1738_v56 }
  0x9e   :  { %v163_v47 = vld.sshfl [vmem:[#allocation1 + $0x20] sm:$0xff pattern:$0x73625140]  ;;  %515 = vmatpush.msra.mxu0 %v1753_v58 }
  0x9f   :  { %vm165_vm3 = vcmp.eq.s32.totalorder %v90_v41, %v163_v47  ;;  %v1839_v47 = vld [vmem:[%s1994_s4 + $0x2] ss:$0 sm:$0xff] }
  0xa0   :  { %v1357_v48 = vsel %vm165_vm3, 1.0, %v1642_v45  ;;  %516 = vmatpush.msra.mxu0 %v1756_v59 }
  0xa1   :  { %1360 = vmatmul.msk.f32.gmra.mxu0 %vm173_vm1, %v1357_v48 }
  0xa9   :  { %1367 = vmatmul.msk.f32.vlgmr.msrb.gmra.mxu0 %vm263_vm5, %v1743_v57 }
  0xaa   :  { %701 = vmatpush.msrb.mxu0 %v1758_v60 }
  0xac   :  { %702 = vmatpush.msrb.mxu0 %v1765_v61 }
  0xae   :  { %703 = vmatpush.msrb.mxu0 %v1769_v62 }
  0xb0   :  { %704 = vmatpush.msrb.mxu0 %v1773_v63 }
 0x116   :  { %v201_v0 = vpop.f32.mrf.mxu0 }
 0x117   :  { %210 = vst.sshfl [vmem:[#allocation1] sm:$0xff pattern:$0x73625140] %v201_v0  ;;  %1361 = vmatmul.msk.f32.vlgmr.msra.gmra.mxu1 %vm263_vm5, %v201_v0  ;;  %1363 = vmatmul.msk.f32.vlgmr.msra.gmra.mxu2 %vm263_vm5, %v201_v0 }
 0x118   :  { %1365 = vmatmul.msk.f32.vlgmr.msra.gmra.mxu3 %vm263_vm5, %v201_v0  ;;  %208 = vst.msk [vmem:[#allocation11] sm:$0x3] %vm79_vm4, %v201_v0  ;;  %579 = vmatpush.msra.mxu1 %v1758_v60 }
 0x119   :  { %615 = vmatpush.msra.mxu2 %v1721_v19  ;;  %635 = vmatpush.msra.mxu3 %v1734_v54 }
 0x11a   :  { %580 = vmatpush.msra.mxu1 %v1765_v61 }
 0x11b   :  { %616 = vmatpush.msra.mxu2 %v1724_v28  ;;  %636 = vmatpush.msra.mxu3 %v1738_v56 }
 0x11c   :  { %581 = vmatpush.msra.mxu1 %v1769_v62 }
 0x11d   :  { %617 = vmatpush.msra.mxu2 %v1731_v53  ;;  %637 = vmatpush.msra.mxu3 %v1753_v58 }
 0x11e   :  { %v204_v1 = vpop.f32.mrf.mxu0  ;;  %v212_v2 = vld [vmem:[#allocation1 + $0x1] ss:$4 sm:$0xff]  ;;  %582 = vmatpush.msra.mxu1 %v1773_v63 }
 0x11f   :  { %234 = vst.msk [vmem:[#allocation11 + $0x2] sm:$0x3] %vm79_vm4, %v204_v1  ;;  %213 = vrot.lane.b32.xlu2 %v212_v2, %s1643_s5  ;;  %1362 = vmatmul.msk.f32.gmra.mxu1 %vm263_vm5, %v204_v1 }
 0x120   :  { %218 = vst.sshfl [vmem:[#allocation1] sm:$0xff pattern:$0x73625140] %v201_v0  ;;  %1364 = vmatmul.msk.f32.gmra.mxu2 %vm263_vm5, %v204_v1  ;;  %1366 = vmatmul.msk.f32.gmra.mxu3 %vm263_vm5, %v204_v1 }
 0x121   :  { %618 = vmatpush.msra.mxu2 %v1736_v55  ;;  %638 = vmatpush.msra.mxu3 %v1756_v59 }
 0x126   :  { %v388_v11 = vpop.f32.mrf.mxu0 }
 0x127   :  { %v220_v3 = vld [vmem:[#allocation1 + $0x2] ss:$4 sm:$0xff]  ;;  %1368 = vmatmul.msk.f32.vlgmr.msrb.gmra.mxu1 %vm263_vm5, %v1743_v57 }
 0x128   :  { %221 = vrot.lane.b32.xlu1 %v220_v3, %s1644_s9  ;;  %226 = vst.sshfl [vmem:[#allocation1] sm:$0xff pattern:$0x73625140] %v201_v0  ;;  %1371 = vmatmul.msk.f32.vlgmr.msrb.gmra.mxu2 %vm263_vm5, %v1743_v57 }
 0x129   :  { %737 = vmatpush.msrb.mxu1 %v1721_v19  ;;  %757 = vmatpush.msrb.mxu2 %v1734_v54 }
 0x12b   :  { %738 = vmatpush.msrb.mxu1 %v1724_v28  ;;  %758 = vmatpush.msrb.mxu2 %v1738_v56 }
 0x12d   :  { %739 = vmatpush.msrb.mxu1 %v1731_v53  ;;  %759 = vmatpush.msrb.mxu2 %v1753_v58 }
 0x12f   :  { %v228_v4 = vld [vmem:[#allocation1 + $0x3] ss:$4 sm:$0xff]  ;;  %740 = vmatpush.msrb.mxu1 %v1736_v55  ;;  %760 = vmatpush.msrb.mxu2 %v1756_v59 }
 0x130   :  { %236 = vst.sshfl [vmem:[#allocation1] sm:$0xff pattern:$0x73625140] %v204_v1 }
 0x137   :  { %v238_v5 = vld [vmem:[#allocation1 + $0x1] ss:$4 sm:$0xff] }
 0x138   :  { %239 = vrot.lane.b32.xlu0 %v238_v5, %s1643_s5  ;;  %243 = vst.sshfl [vmem:[#allocation1] sm:$0xff pattern:$0x73625140] %v204_v1 }
 0x13f   :  { %v245_v6 = vld [vmem:[#allocation1 + $0x2] ss:$4 sm:$0xff] }
 0x140   :  { %229 = vrot.lane.b32.xlu0 %v228_v4, %s1645_s10  ;;  %246 = vrot.lane.b32.xlu2 %v245_v6, %s1644_s9  ;;  %250 = vst.sshfl [vmem:[#allocation1] sm:$0xff pattern:$0x73625140] %v204_v1 }
 0x147   :  { %v252_v7 = vld [vmem:[#allocation1 + $0x3] ss:$4 sm:$0xff] }
 0x148   :  { %253 = vrot.lane.b32.xlu1 %v252_v7, %s1645_s10 }
 0x179   :  { %v214_v8 = vpop.permute.xlu2 %213 }
 0x17a   :  { %217 = vst.msk [vmem:[#allocation11] sm:$0x3] %vm216_vm6, %v214_v8 }
 0x194   :  { %v285_v10 = vpop.f32.mrf.mxu1 }
 0x195   :  { %v1813_v12 = vadd.f32 %v1423_v9, %v285_v10 }
 0x197   :  { %v411_v13 = vadd.f32 %v388_v11, %v1813_v12 }
 0x199   :  { %v1369_v14 = vmul.f32 -1.442695, %v411_v13 }
 0x19a   :  { %v222_v15 = vpop.permute.xlu1 %221  ;;  %v315_v16 = vpop.f32.mrf.mxu2 }
 0x19b   :  { %1427 = vpow2.f32 %v1369_v14  ;;  %225 = vst.msk [vmem:[#allocation11] sm:$0x3] %vm224_vm7, %v222_v15  ;;  %v1822_v23 = vadd.f32 %v1424_v20, %v315_v16  ;;  %v247_v32 = vpop.permute.xlu2 %246  ;;  %v345_v49 = vpop.f32.mrf.mxu3 }
 0x19c   :  { %v288_v17 = vpop.f32.mrf.mxu1  ;;  %v1842_v52 = vadd.f32 %v1839_v47, %v345_v49 }
 0x19d   :  { %v1817_v18 = vadd.f32 %v1423_v9, %v288_v17 }
 0x1a1   :  { %v1428_v21 = vpop.eup %1427 }
 0x1a2   :  { %v415_v22 = vadd.f32 1.0, %v1428_v21 }
 0x1a3   :  { %v318_v24 = vpop.f32.mrf.mxu2 }
 0x1a4   :  { %1429 = vrcp.f32 %v415_v22  ;;  %v1824_v25 = vadd.f32 %v1424_v20, %v318_v24  ;;  %v408_v26 = vpop.f32.mrf.mxu1  ;;  %v427_v36 = vand.u32 2147483648, %v415_v22  ;;  %v425_v39 = vand.u32 2147483647, %v415_v22 }
 0x1a5   :  { %v431_v27 = vadd.f32 %v408_v26, %v1822_v23  ;;  %vm421_vm10 = vweird.f32 %v415_v22 }
 0x1a6   :  { %v428_v44 = vor.u32 1.1754944e-38, %v427_v36  ;;  %vm426_vm12 = vcmp.eq.f32.partialorder %v425_v39, 8.507059e+37 }
 0x1a7   :  { %v1370_v29 = vmul.f32 -1.442695, %v431_v27 }
 0x1a9   :  { %1431 = vpow2.f32 %v1370_v29 }
 0x1aa   :  { %v1430_v30 = vpop.eup %1429  ;;  %v240_v31 = vpop.permute.xlu0 %239 }
 0x1ab   :  { %242 = vst.msk [vmem:[#allocation11 + $0x2] sm:$0x3] %vm216_vm6, %v240_v31  ;;  %v417_v33 = vmul.f32 %v1430_v30, %v415_v22  ;;  %vm422_vm8 = vweird.f32 %v1430_v30  ;;  %v468_v40 = vpop.f32.mrf.mxu2 }
 0x1ac   :  { %249 = vst.msk [vmem:[#allocation11 + $0x2] sm:$0x3] %vm224_vm7, %v247_v32  ;;  %vm423_vm11 = vmor %vm421_vm10, %vm422_vm8  ;;  %v469_v45 = vadd.f32 %v1832_v35, %v468_v40 }
 0x1ad   :  { %v418_v34 = vsub.f32 1.0, %v417_v33 }
 0x1af   :  { %v1432_v37 = vpop.eup %1431  ;;  %v419_v38 = vmul.f32 %v1430_v30, %v418_v34 }
 0x1b0   :  { %v435_v41 = vadd.f32 1.0, %v1432_v37 }
 0x1b1   :  { %v420_v42 = vadd.f32 %v1430_v30, %v419_v38 }
 0x1b2   :  { %1433 = vrcp.f32 %v435_v41  ;;  %v230_v43 = vpop.permute.xlu0 %229  ;;  %v447_v4 = vand.u32 2147483648, %v435_v41  ;;  %v445_v6 = vand.u32 2147483647, %v435_v41  ;;  %vm441_vm14 = vweird.f32 %v435_v41 }
 0x1b3   :  { %233 = vst.msk [vmem:[#allocation11] sm:$0x3] %vm232_vm9, %v230_v43  ;;  %v424_v46 = vsel %vm423_vm11, %v1430_v30, %v420_v42 }
 0x1b4   :  { %v429_v48 = vsel %vm426_vm12, %v428_v44, %v424_v46  ;;  %v448_v8 = vor.u32 1.1754944e-38, %v447_v4  ;;  %vm446_vm0 = vcmp.eq.f32.partialorder %v445_v6, 8.507059e+37 }
 0x1b5   :  { %v471_v50 = vmul.f32 %v469_v45, %v429_v48 }
 0x1b7   :  { %v472_v1 = vadd.f32 %v471_v50, %v1842_v52 }
 0x1b8   :  { %v1434_v51 = vpop.eup %1433 }
 0x1b9   :  { %v437_v0 = vmul.f32 %v1434_v51, %v435_v41  ;;  %vm442_vm13 = vweird.f32 %v1434_v51  ;;  %1435 = vtanh.f32 %v472_v1 }
 0x1ba   :  { %v254_v2 = vpop.permute.xlu1 %253  ;;  %vm443_vm15 = vmor %vm441_vm14, %vm442_vm13 }
 0x1bb   :  { %v438_v3 = vsub.f32 1.0, %v437_v0  ;;  %256 = vst.msk [vmem:[#allocation11 + $0x2] sm:$0x3] %vm232_vm9, %v254_v2 }
 0x1bc   :  { %1332 = dma.vmem_to_hbm [thread:$0]  %s1328_s19, 64, %s1330_s3, [#allocation7]  }
 0x1bd   :  { %v439_v5 = vmul.f32 %v1434_v51, %v438_v3 }
 0x1bf   :  { %v440_v7 = vadd.f32 %v1434_v51, %v439_v5  ;;  %v1436_v13 = vpop.eup %1435 }
 0x1c1   :  { %v444_v9 = vsel %vm443_vm15, %v1434_v51, %v440_v7 }
 0x1c2   :  { %v449_v10 = vsel %vm446_vm0, %v448_v8, %v444_v9 }
 0x1c3   :  { %v474_v11 = vsub.f32 1.0, %v449_v10  ;;  %v476_v15 = vmul.f32 %v449_v10, %v1743_v57  ;;  %v1867_v57 = vpop.f32.mrf.mxu3 }
 0x1c5   :  { %v475_v14 = vmul.f32 %v1436_v13, %v474_v11 }
 0x1c7   :  { %v1847_v16 = vadd.f32 %v476_v15, %v475_v14 }
 0x1c9   :  { %1372 = vmatmul.msk.f32.vlgmr.msrb.gmra.mxu3 %vm263_vm5, %v1847_v16  ;;  %1373 = vmatmul.msk.f32.vlgmr.msra.gmra.mxu0 %vm263_vm5, %v1847_v16  ;;  %v595_v9 = vrot.slane %v1847_v16, 6 }
 0x1ca   :  { %1376 = vmatmul.msk.f32.vlgmr.msra.gmra.mxu1 %vm263_vm5, %v1847_v16  ;;  %823 = vmatpush.msrb.mxu3 %v1758_v60 }
 0x1cb   :  { %859 = vmatpush.msra.mxu0 %v1721_v19  ;;  %879 = vmatpush.msra.mxu1 %v1734_v54 }
 0x1cc   :  { %824 = vmatpush.msrb.mxu3 %v1765_v61 }
 0x1cd   :  { %860 = vmatpush.msra.mxu0 %v1724_v28  ;;  %880 = vmatpush.msra.mxu1 %v1738_v56 }
 0x1ce   :  { %825 = vmatpush.msrb.mxu3 %v1769_v62 }
 0x1cf   :  { %861 = vmatpush.msra.mxu0 %v1731_v53  ;;  %881 = vmatpush.msra.mxu1 %v1753_v58 }
 0x1d0   :  { %826 = vmatpush.msrb.mxu3 %v1773_v63 }
 0x1d1   :  { %862 = vmatpush.msra.mxu0 %v1736_v55  ;;  %882 = vmatpush.msra.mxu1 %v1756_v59 }
 0x246   :  { %v518_v17 = vpop.f32.mrf.mxu0 }
 0x247   :  { %v545_v20 = vrot.slane %v518_v17, 6  ;;  %v584_v40 = vpop.f32.mrf.mxu1 }
 0x248   :  { %v585_v43 = vadd.f32 %v1832_v35, %v584_v40 }
 0x249   :  { %v547_v21 = vadd.f32 %v545_v20, %v1822_v23 }
 0x24a   :  { %v588_v50 = vrot.slane %v585_v43, 6 }
 0x24b   :  { %v1375_v22 = vmul.f32 -1.442695, %v547_v21 }
 0x24c   :  { %v498_v24 = vpop.f32.mrf.mxu3 }
 0x24d   :  { %1437 = vpow2.f32 %v1375_v22  ;;  %v522_v26 = vrot.slane %v498_v24, 6 }
 0x24f   :  { %v524_v27 = vadd.f32 %v522_v26, %v1813_v12 }
 0x251   :  { %v1374_v29 = vmul.f32 -1.442695, %v524_v27 }
 0x253   :  { %v1438_v30 = vpop.eup %1437  ;;  %1439 = vpow2.f32 %v1374_v29 }
 0x254   :  { %v551_v31 = vadd.f32 1.0, %v1438_v30 }
 0x256   :  { %1441 = vrcp.f32 %v551_v31  ;;  %v563_v2 = vand.u32 2147483648, %v551_v31  ;;  %vm557_vm7 = vweird.f32 %v551_v31  ;;  %v561_v4 = vand.u32 2147483647, %v551_v31 }
 0x258   :  { %v564_v7 = vor.u32 1.1754944e-38, %v563_v2  ;;  %vm562_vm9 = vcmp.eq.f32.partialorder %v561_v4, 8.507059e+37 }
 0x259   :  { %v1440_v32 = vpop.eup %1439 }
 0x25a   :  { %v528_v33 = vadd.f32 1.0, %v1440_v32 }
 0x25c   :  { %1443 = vrcp.f32 %v528_v33  ;;  %v1442_v34 = vpop.eup %1441  ;;  %v540_v42 = vand.u32 2147483648, %v528_v33  ;;  %v538_v45 = vand.u32 2147483647, %v528_v33  ;;  %vm534_vm2 = vweird.f32 %v528_v33 }
 0x25d   :  { %v553_v36 = vmul.f32 %v1442_v34, %v551_v31  ;;  %vm558_vm6 = vweird.f32 %v1442_v34 }
 0x25e   :  { %v541_v49 = vor.u32 1.1754944e-38, %v540_v42  ;;  %vm539_vm4 = vcmp.eq.f32.partialorder %v538_v45, 8.507059e+37  ;;  %vm559_vm8 = vmor %vm557_vm7, %vm558_vm6 }
 0x25f   :  { %v554_v39 = vsub.f32 1.0, %v553_v36 }
 0x261   :  { %v555_v46 = vmul.f32 %v1442_v34, %v554_v39 }
 0x262   :  { %v1444_v37 = vpop.eup %1443 }
 0x263   :  { %v530_v38 = vmul.f32 %v1444_v37, %v528_v33  ;;  %vm535_vm1 = vweird.f32 %v1444_v37  ;;  %v556_v0 = vadd.f32 %v1442_v34, %v555_v46 }
 0x264   :  { %vm536_vm3 = vmor %vm534_vm2, %vm535_vm1 }
 0x265   :  { %v531_v41 = vsub.f32 1.0, %v530_v38  ;;  %v560_v6 = vsel %vm559_vm8, %v1442_v34, %v556_v0 }
 0x266   :  { %v565_v8 = vsel %vm562_vm9, %v564_v7, %v560_v6 }
 0x267   :  { %v532_v44 = vmul.f32 %v1444_v37, %v531_v41  ;;  %v593_v10 = vsub.f32 1.0, %v565_v8  ;;  %v597_v14 = vmul.f32 %v595_v9, %v565_v8 }
 0x269   :  { %v533_v48 = vadd.f32 %v1444_v37, %v532_v44 }
 0x26b   :  { %v537_v51 = vsel %vm536_vm3, %v1444_v37, %v533_v48 }
 0x26c   :  { %v542_v1 = vsel %vm539_vm4, %v541_v49, %v537_v51 }
 0x26d   :  { %v590_v3 = vmul.f32 %v588_v50, %v542_v1 }
 0x26f   :  { %v591_v5 = vadd.f32 %v590_v3, %v1842_v52 }
 0x271   :  { %1445 = vtanh.f32 %v591_v5 }
 0x277   :  { %v1446_v11 = vpop.eup %1445 }
 0x278   :  { %v594_v13 = vmul.f32 %v1446_v11, %v593_v10 }
 0x27a   :  { %v1874_v15 = vadd.f32 %v597_v14, %v594_v13 }
 0x27c   :  { %v600_v17 = vrot.slane %v1874_v15, 2  ;;  %v717_v9 = vrot.slane %v1874_v15, 6 }
 0x27e   :  { %1377 = vmatmul.msk.f32.vlgmr.msra.gmra.mxu2 %vm263_vm5, %v600_v17  ;;  %1378 = vmatmul.msk.f32.vlgmr.msra.gmra.mxu3 %vm263_vm5, %v600_v17 }
 0x27f   :  { %1381 = vmatmul.msk.f32.vlgmr.msrb.gmra.mxu0 %vm263_vm5, %v600_v17  ;;  %939 = vmatpush.msra.mxu2 %v1758_v60 }
 0x280   :  { %970 = vmatpush.msra.mxu3 %v1721_v19  ;;  %990 = vmatpush.msrb.mxu0 %v1734_v54 }
 0x281   :  { %940 = vmatpush.msra.mxu2 %v1765_v61 }
 0x282   :  { %971 = vmatpush.msra.mxu3 %v1724_v28  ;;  %991 = vmatpush.msrb.mxu0 %v1738_v56 }
 0x283   :  { %941 = vmatpush.msra.mxu2 %v1769_v62 }
 0x284   :  { %972 = vmatpush.msra.mxu3 %v1731_v53  ;;  %992 = vmatpush.msrb.mxu0 %v1753_v58 }
 0x285   :  { %942 = vmatpush.msra.mxu2 %v1773_v63 }
 0x286   :  { %973 = vmatpush.msra.mxu3 %v1736_v55  ;;  %993 = vmatpush.msrb.mxu0 %v1756_v59 }
 0x2fc   :  { %v706_v38 = vpop.f32.mrf.mxu0 }
 0x2fd   :  { %v707_v43 = vadd.f32 %v1832_v35, %v706_v38 }
 0x2ff   :  { %v710_v50 = vrot.slane %v707_v43, 4 }
 0x301   :  { %v620_v16 = vpop.f32.mrf.mxu2  ;;  %v640_v20 = vpop.f32.mrf.mxu3 }
 0x302   :  { %v644_v21 = vrot.slane %v620_v16, 4  ;;  %v667_v22 = vrot.slane %v640_v20, 4 }
 0x304   :  { %v646_v24 = vadd.f32 %v644_v21, %v1813_v12  ;;  %v669_v26 = vadd.f32 %v667_v22, %v1822_v23 }
 0x306   :  { %v1379_v27 = vmul.f32 -1.442695, %v646_v24  ;;  %v1380_v29 = vmul.f32 -1.442695, %v669_v26 }
 0x308   :  { %1447 = vpow2.f32 %v1379_v27 }
 0x309   :  { %1449 = vpow2.f32 %v1380_v29 }
 0x30e   :  { %v1448_v30 = vpop.eup %1447 }
 0x30f   :  { %v1450_v31 = vpop.eup %1449  ;;  %v650_v32 = vadd.f32 1.0, %v1448_v30 }
 0x310   :  { %v673_v33 = vadd.f32 1.0, %v1450_v31 }
 0x311   :  { %1451 = vrcp.f32 %v650_v32  ;;  %v662_v41 = vand.u32 2147483648, %v650_v32  ;;  %v660_v45 = vand.u32 2147483647, %v650_v32  ;;  %vm656_vm11 = vweird.f32 %v650_v32 }
 0x312   :  { %1453 = vrcp.f32 %v673_v33  ;;  %v685_v3 = vand.u32 2147483648, %v673_v33  ;;  %vm679_vm15 = vweird.f32 %v673_v33  ;;  %v683_v4 = vand.u32 2147483647, %v673_v33 }
 0x313   :  { %v663_v49 = vor.u32 1.1754944e-38, %v662_v41  ;;  %vm661_vm13 = vcmp.eq.f32.partialorder %v660_v45, 8.507059e+37 }
 0x314   :  { %v686_v7 = vor.u32 1.1754944e-38, %v685_v3  ;;  %vm684_vm1 = vcmp.eq.f32.partialorder %v683_v4, 8.507059e+37 }
 0x317   :  { %v1452_v34 = vpop.eup %1451 }
 0x318   :  { %v1454_v36 = vpop.eup %1453  ;;  %v652_v37 = vmul.f32 %v1452_v34, %v650_v32  ;;  %vm657_vm10 = vweird.f32 %v1452_v34 }
 0x319   :  { %v675_v39 = vmul.f32 %v1454_v36, %v673_v33  ;;  %vm658_vm12 = vmor %vm656_vm11, %vm657_vm10  ;;  %vm680_vm14 = vweird.f32 %v1454_v36 }
 0x31a   :  { %v653_v40 = vsub.f32 1.0, %v652_v37  ;;  %vm681_vm0 = vmor %vm679_vm15, %vm680_vm14 }
 0x31b   :  { %v676_v42 = vsub.f32 1.0, %v675_v39 }
 0x31c   :  { %v654_v44 = vmul.f32 %v1452_v34, %v653_v40 }
 0x31d   :  { %v677_v46 = vmul.f32 %v1454_v36, %v676_v42 }
 0x31e   :  { %v655_v48 = vadd.f32 %v1452_v34, %v654_v44 }
 0x31f   :  { %v678_v1 = vadd.f32 %v1454_v36, %v677_v46 }
 0x320   :  { %v659_v51 = vsel %vm658_vm12, %v1452_v34, %v655_v48 }
 0x321   :  { %v664_v0 = vsel %vm661_vm13, %v663_v49, %v659_v51  ;;  %v682_v6 = vsel %vm681_vm0, %v1454_v36, %v678_v1 }
 0x322   :  { %v712_v2 = vmul.f32 %v710_v50, %v664_v0  ;;  %v687_v8 = vsel %vm684_vm1, %v686_v7, %v682_v6 }
 0x323   :  { %v715_v10 = vsub.f32 1.0, %v687_v8  ;;  %v719_v14 = vmul.f32 %v717_v9, %v687_v8 }
 0x324   :  { %v713_v5 = vadd.f32 %v712_v2, %v1842_v52 }
 0x326   :  { %1455 = vtanh.f32 %v713_v5 }
 0x32c   :  { %v1456_v11 = vpop.eup %1455 }
 0x32d   :  { %v716_v13 = vmul.f32 %v1456_v11, %v715_v10 }
 0x32f   :  { %v1897_v17 = vadd.f32 %v719_v14, %v716_v13 }
 0x331   :  { %v722_v16 = vrot.slane %v1897_v17, 4  ;;  %v839_v7 = vrot.slane %v1897_v17, 6 }
 0x333   :  { %1382 = vmatmul.msk.f32.vlgmr.msrb.gmra.mxu1 %vm263_vm5, %v722_v16  ;;  %1383 = vmatmul.msk.f32.vlgmr.msrb.gmra.mxu2 %vm263_vm5, %v722_v16 }
 0x334   :  { %1386 = vmatmul.msk.f32.vlgmr.msrb.gmra.mxu3 %vm263_vm5, %v722_v16  ;;  %1056 = vmatpush.msrb.mxu1 %v1758_v60 }
 0x335   :  { %1092 = vmatpush.msrb.mxu2 %v1721_v19  ;;  %1112 = vmatpush.msrb.mxu3 %v1734_v54 }
 0x336   :  { %1057 = vmatpush.msrb.mxu1 %v1765_v61 }
 0x337   :  { %1093 = vmatpush.msrb.mxu2 %v1724_v28  ;;  %1113 = vmatpush.msrb.mxu3 %v1738_v56 }
 0x338   :  { %1058 = vmatpush.msrb.mxu1 %v1769_v62 }
 0x339   :  { %1094 = vmatpush.msrb.mxu2 %v1731_v53  ;;  %1114 = vmatpush.msrb.mxu3 %v1753_v58 }
 0x33a   :  { %1059 = vmatpush.msrb.mxu1 %v1773_v63 }
 0x33b   :  { %1095 = vmatpush.msrb.mxu2 %v1736_v55  ;;  %1115 = vmatpush.msrb.mxu3 %v1756_v59 }
 0x3b0   :  { %v742_v15 = vpop.f32.mrf.mxu1 }
 0x3b1   :  { %v766_v20 = vrot.slane %v742_v15, 2 }
 0x3b3   :  { %v768_v21 = vadd.f32 %v766_v20, %v1813_v12 }
 0x3b5   :  { %v1384_v22 = vmul.f32 -1.442695, %v768_v21 }
 0x3b6   :  { %v762_v24 = vpop.f32.mrf.mxu2 }
 0x3b7   :  { %1457 = vpow2.f32 %v1384_v22  ;;  %v789_v26 = vrot.slane %v762_v24, 2  ;;  %v828_v37 = vpop.f32.mrf.mxu3 }
 0x3b8   :  { %v829_v41 = vadd.f32 %v1832_v35, %v828_v37 }
 0x3b9   :  { %v791_v27 = vadd.f32 %v789_v26, %v1822_v23 }
 0x3ba   :  { %v832_v48 = vrot.slane %v829_v41, 2 }
 0x3bb   :  { %v1385_v29 = vmul.f32 -1.442695, %v791_v27 }
 0x3bd   :  { %v1458_v30 = vpop.eup %1457  ;;  %1459 = vpow2.f32 %v1385_v29 }
 0x3be   :  { %v772_v31 = vadd.f32 1.0, %v1458_v30 }
 0x3c0   :  { %1461 = vrcp.f32 %v772_v31  ;;  %v784_v39 = vand.u32 2147483648, %v772_v31  ;;  %v782_v40 = vand.u32 2147483647, %v772_v31  ;;  %vm778_vm3 = vweird.f32 %v772_v31 }
 0x3c2   :  { %v785_v44 = vor.u32 1.1754944e-38, %v784_v39  ;;  %vm783_vm6 = vcmp.eq.f32.partialorder %v782_v40, 8.507059e+37  ;;  %v1945_v39 = vadd.f32 %v1839_v47, %v1867_v57 }
 0x3c3   :  { %v1460_v32 = vpop.eup %1459 }
 0x3c4   :  { %v795_v33 = vadd.f32 1.0, %v1460_v32 }
 0x3c6   :  { %v1462_v34 = vpop.eup %1461  ;;  %1463 = vrcp.f32 %v795_v33  ;;  %v807_v51 = vand.u32 2147483648, %v795_v33  ;;  %v805_v1 = vand.u32 2147483647, %v795_v33  ;;  %vm801_vm8 = vweird.f32 %v795_v33 }
 0x3c7   :  { %v774_v36 = vmul.f32 %v1462_v34, %v772_v31  ;;  %vm779_vm2 = vweird.f32 %v1462_v34 }
 0x3c8   :  { %vm780_vm4 = vmor %vm778_vm3, %vm779_vm2  ;;  %v808_v4 = vor.u32 1.1754944e-38, %v807_v51  ;;  %vm806_vm10 = vcmp.eq.f32.partialorder %v805_v1, 8.507059e+37 }
 0x3c9   :  { %v775_v38 = vsub.f32 1.0, %v774_v36 }
 0x3cb   :  { %v776_v12 = vmul.f32 %v1462_v34, %v775_v38 }
 0x3cc   :  { %v1464_v42 = vpop.eup %1463 }
 0x3cd   :  { %v797_v23 = vmul.f32 %v1464_v42, %v795_v33  ;;  %v777_v43 = vadd.f32 %v1462_v34, %v776_v12  ;;  %vm802_vm7 = vweird.f32 %v1464_v42 }
 0x3ce   :  { %vm803_vm9 = vmor %vm801_vm8, %vm802_vm7 }
 0x3cf   :  { %v798_v45 = vsub.f32 1.0, %v797_v23  ;;  %v781_v46 = vsel %vm780_vm4, %v1462_v34, %v777_v43 }
 0x3d0   :  { %v786_v49 = vsel %vm783_vm6, %v785_v44, %v781_v46 }
 0x3d1   :  { %v799_v50 = vmul.f32 %v1464_v42, %v798_v45  ;;  %v834_v0 = vmul.f32 %v832_v48, %v786_v49 }
 0x3d3   :  { %v800_v2 = vadd.f32 %v1464_v42, %v799_v50  ;;  %v835_v3 = vadd.f32 %v834_v0, %v1842_v52 }
 0x3d5   :  { %v804_v5 = vsel %vm803_vm9, %v1464_v42, %v800_v2  ;;  %1465 = vtanh.f32 %v835_v3 }
 0x3d6   :  { %v809_v6 = vsel %vm806_vm10, %v808_v4, %v804_v5 }
 0x3d7   :  { %v837_v8 = vsub.f32 1.0, %v809_v6  ;;  %v841_v11 = vmul.f32 %v839_v7, %v809_v6 }
 0x3db   :  { %v1466_v9 = vpop.eup %1465 }
 0x3dc   :  { %v838_v10 = vmul.f32 %v1466_v9, %v837_v8 }
 0x3de   :  { %v842_v13 = vadd.f32 %v841_v11, %v838_v10 }
 0x3e0   :  { %v1920_v14 = vrot.slane %v842_v13, 6 }
 0x3e2   :  { %1387 = vmatmul.msk.f32.vlgmr.msra.gmra.mxu0 %vm263_vm5, %v1920_v14  ;;  %1388 = vmatmul.msk.f32.vlgmr.msra.gmra.mxu1 %vm263_vm5, %v1920_v14 }
 0x3e3   :  { %1391 = vmatmul.msk.f32.vlgmr.msra.gmra.mxu2 %vm263_vm5, %v1920_v14  ;;  %1178 = vmatpush.msra.mxu0 %v1758_v60 }
 0x3e4   :  { %1214 = vmatpush.msra.mxu1 %v1721_v19  ;;  %1234 = vmatpush.msra.mxu2 %v1734_v54 }
 0x3e5   :  { %1179 = vmatpush.msra.mxu0 %v1765_v61 }
 0x3e6   :  { %1215 = vmatpush.msra.mxu1 %v1724_v28  ;;  %1235 = vmatpush.msra.mxu2 %v1738_v56 }
 0x3e7   :  { %1180 = vmatpush.msra.mxu0 %v1769_v62 }
 0x3e8   :  { %1216 = vmatpush.msra.mxu1 %v1731_v53  ;;  %1236 = vmatpush.msra.mxu2 %v1753_v58 }
 0x3e9   :  { %1181 = vmatpush.msra.mxu0 %v1773_v63 }
 0x3ea   :  { %1217 = vmatpush.msra.mxu1 %v1736_v55  ;;  %1237 = vmatpush.msra.mxu2 %v1756_v59 }
 0x45f   :  { %v864_v19 = vpop.f32.mrf.mxu0  ;;  %v884_v54 = vpop.f32.mrf.mxu1 }
 0x460   :  { %v887_v52 = vadd.f32 %v864_v19, %v1817_v18  ;;  %v907_v28 = vadd.f32 %v884_v54, %v1824_v25 }
 0x462   :  { %v1389_v17 = vmul.f32 -1.442695, %v887_v52  ;;  %v1390_v56 = vmul.f32 -1.442695, %v907_v28 }
 0x464   :  { %1467 = vpow2.f32 %v1389_v17 }
 0x465   :  { %1469 = vpow2.f32 %v1390_v56 }
 0x466   :  { %v944_v31 = vpop.f32.mrf.mxu2 }
 0x467   :  { %v945_v36 = vadd.f32 %v1832_v35, %v944_v31 }
 0x46a   :  { %v1468_v16 = vpop.eup %1467 }
 0x46b   :  { %v1470_v53 = vpop.eup %1469  ;;  %v891_v15 = vadd.f32 1.0, %v1468_v16 }
 0x46c   :  { %v911_v58 = vadd.f32 1.0, %v1470_v53 }
 0x46d   :  { %1471 = vrcp.f32 %v891_v15  ;;  %v903_v26 = vand.u32 2147483648, %v891_v15  ;;  %v901_v29 = vand.u32 2147483647, %v891_v15  ;;  %vm897_vm12 = vweird.f32 %v891_v15 }
 0x46e   :  { %1473 = vrcp.f32 %v911_v58  ;;  %v923_v12 = vand.u32 2147483648, %v911_v58  ;;  %vm917_vm0 = vweird.f32 %v911_v58  ;;  %v921_v41 = vand.u32 2147483647, %v911_v58 }
 0x46f   :  { %v904_v33 = vor.u32 1.1754944e-38, %v903_v26  ;;  %vm902_vm14 = vcmp.eq.f32.partialorder %v901_v29, 8.507059e+37 }
 0x470   :  { %v924_v43 = vor.u32 1.1754944e-38, %v923_v12  ;;  %vm922_vm2 = vcmp.eq.f32.partialorder %v921_v41, 8.507059e+37 }
 0x473   :  { %v1472_v20 = vpop.eup %1471 }
 0x474   :  { %v1474_v55 = vpop.eup %1473  ;;  %v893_v21 = vmul.f32 %v1472_v20, %v891_v15  ;;  %vm898_vm11 = vweird.f32 %v1472_v20 }
 0x475   :  { %v913_v59 = vmul.f32 %v1474_v55, %v911_v58  ;;  %vm899_vm13 = vmor %vm897_vm12, %vm898_vm11  ;;  %vm918_vm15 = vweird.f32 %v1474_v55 }
 0x476   :  { %v894_v22 = vsub.f32 1.0, %v893_v21  ;;  %vm919_vm1 = vmor %vm917_vm0, %vm918_vm15 }
 0x477   :  { %v914_v24 = vsub.f32 1.0, %v913_v59 }
 0x478   :  { %v895_v27 = vmul.f32 %v1472_v20, %v894_v22 }
 0x479   :  { %v915_v30 = vmul.f32 %v1474_v55, %v914_v24 }
 0x47a   :  { %v896_v32 = vadd.f32 %v1472_v20, %v895_v27 }
 0x47b   :  { %v916_v37 = vadd.f32 %v1474_v55, %v915_v30 }
 0x47c   :  { %v900_v34 = vsel %vm899_vm13, %v1472_v20, %v896_v32 }
 0x47d   :  { %v905_v38 = vsel %vm902_vm14, %v904_v33, %v900_v34  ;;  %v920_v23 = vsel %vm919_vm1, %v1474_v55, %v916_v37 }
 0x47e   :  { %v947_v40 = vmul.f32 %v945_v36, %v905_v38  ;;  %v925_v44 = vsel %vm922_vm2, %v924_v43, %v920_v23 }
 0x47f   :  { %v950_v45 = vsub.f32 1.0, %v925_v44  ;;  %v953_v49 = vmul.f32 %v925_v44, %v1920_v14 }
 0x480   :  { %v948_v42 = vadd.f32 %v947_v40, %v1945_v39 }
 0x482   :  { %1475 = vtanh.f32 %v948_v42 }
 0x488   :  { %v1476_v46 = vpop.eup %1475 }
 0x489   :  { %v951_v48 = vmul.f32 %v1476_v46, %v950_v45 }
 0x48b   :  { %v1949_v50 = vadd.f32 %v953_v49, %v951_v48 }
 0x48d   :  { %1392 = vmatmul.msk.f32.vlgmr.msra.gmra.mxu3 %vm263_vm5, %v1949_v50  ;;  %1393 = vmatmul.msk.f32.vlgmr.msrb.gmra.mxu0 %vm263_vm5, %v1949_v50  ;;  %v1072_v27 = vrot.slane %v1949_v50, 6 }
 0x48e   :  { %1396 = vmatmul.msk.f32.vlgmr.msrb.gmra.mxu1 %vm263_vm5, %v1949_v50  ;;  %1300 = vmatpush.msra.mxu3 %v1758_v60 }
 0x490   :  { %1301 = vmatpush.msra.mxu3 %v1765_v61 }
 0x492   :  { %1302 = vmatpush.msra.mxu3 %v1769_v62 }
 0x494   :  { %1303 = vmatpush.msra.mxu3 %v1773_v63 }
 0x50a   :  { %v995_v47 = vpop.f32.mrf.mxu0 }
 0x50b   :  { %v1022_v57 = vrot.slane %v995_v47, 6  ;;  %v1061_v10 = vpop.f32.mrf.mxu1 }
 0x50c   :  { %v1062_v14 = vadd.f32 %v1832_v35, %v1061_v10 }
 0x50d   :  { %v1024_v51 = vadd.f32 %v1022_v57, %v1824_v25 }
 0x50e   :  { %v1065_v56 = vrot.slane %v1062_v14, 6 }
 0x50f   :  { %v1395_v0 = vmul.f32 -1.442695, %v1024_v51 }
 0x510   :  { %v975_v1 = vpop.f32.mrf.mxu3 }
 0x511   :  { %1477 = vpow2.f32 %v1395_v0  ;;  %v999_v2 = vrot.slane %v975_v1, 6 }
 0x513   :  { %v1001_v3 = vadd.f32 %v999_v2, %v1817_v18 }
 0x515   :  { %v1394_v4 = vmul.f32 -1.442695, %v1001_v3 }
 0x517   :  { %v1478_v5 = vpop.eup %1477  ;;  %1479 = vpow2.f32 %v1394_v4 }
 0x518   :  { %v1028_v60 = vadd.f32 1.0, %v1478_v5 }
 0x51a   :  { %1481 = vrcp.f32 %v1028_v60  ;;  %v1040_v58 = vand.u32 2147483648, %v1028_v60  ;;  %vm1034_vm9 = vweird.f32 %v1028_v60  ;;  %v1038_v55 = vand.u32 2147483647, %v1028_v60 }
 0x51c   :  { %v1041_v22 = vor.u32 1.1754944e-38, %v1040_v58  ;;  %vm1039_vm11 = vcmp.eq.f32.partialorder %v1038_v55, 8.507059e+37 }
 0x51d   :  { %v1480_v61 = vpop.eup %1479 }
 0x51e   :  { %v1005_v6 = vadd.f32 1.0, %v1480_v61 }
 0x520   :  { %1483 = vrcp.f32 %v1005_v6  ;;  %v1482_v62 = vpop.eup %1481  ;;  %v1017_v13 = vand.u32 2147483648, %v1005_v6  ;;  %v1015_v54 = vand.u32 2147483647, %v1005_v6  ;;  %vm1011_vm4 = vweird.f32 %v1005_v6 }
 0x521   :  { %v1030_v63 = vmul.f32 %v1482_v62, %v1028_v60  ;;  %vm1035_vm8 = vweird.f32 %v1482_v62 }
 0x522   :  { %v1018_v17 = vor.u32 1.1754944e-38, %v1017_v13  ;;  %vm1016_vm7 = vcmp.eq.f32.partialorder %v1015_v54, 8.507059e+37  ;;  %vm1036_vm10 = vmor %vm1034_vm9, %vm1035_vm8 }
 0x523   :  { %v1031_v9 = vsub.f32 1.0, %v1030_v63 }
 0x525   :  { %v1032_v52 = vmul.f32 %v1482_v62, %v1031_v9 }
 0x526   :  { %v1484_v7 = vpop.eup %1483 }
 0x527   :  { %v1007_v8 = vmul.f32 %v1484_v7, %v1005_v6  ;;  %vm1012_vm3 = vweird.f32 %v1484_v7  ;;  %v1033_v53 = vadd.f32 %v1482_v62, %v1032_v52 }
 0x528   :  { %vm1013_vm6 = vmor %vm1011_vm4, %vm1012_vm3 }
 0x529   :  { %v1008_v11 = vsub.f32 1.0, %v1007_v8  ;;  %v1037_v59 = vsel %vm1036_vm10, %v1482_v62, %v1033_v53 }
 0x52a   :  { %v1042_v24 = vsel %vm1039_vm11, %v1041_v22, %v1037_v59 }
 0x52b   :  { %v1009_v19 = vmul.f32 %v1484_v7, %v1008_v11  ;;  %v1070_v26 = vsub.f32 1.0, %v1042_v24  ;;  %v1074_v31 = vmul.f32 %v1072_v27, %v1042_v24 }
 0x52d   :  { %v1010_v28 = vadd.f32 %v1484_v7, %v1009_v19 }
 0x52f   :  { %v1014_v16 = vsel %vm1013_vm6, %v1484_v7, %v1010_v28 }
 0x530   :  { %v1019_v15 = vsel %vm1016_vm7, %v1018_v17, %v1014_v16 }
 0x531   :  { %v1067_v20 = vmul.f32 %v1065_v56, %v1019_v15 }
 0x533   :  { %v1068_v21 = vadd.f32 %v1067_v20, %v1945_v39 }
 0x535   :  { %1485 = vtanh.f32 %v1068_v21 }
 0x53b   :  { %v1486_v29 = vpop.eup %1485 }
 0x53c   :  { %v1071_v30 = vmul.f32 %v1486_v29, %v1070_v26 }
 0x53e   :  { %v1075_v32 = vadd.f32 %v1074_v31, %v1071_v30 }
 0x540   :  { %v1077_v33 = vrot.slane %v1075_v32, 2  ;;  %v1194_v19 = vrot.slane %v1075_v32, 6 }
 0x542   :  { %1397 = vmatmul.msk.f32.vlgmr.msrb.gmra.mxu2 %vm263_vm5, %v1077_v33  ;;  %1398 = vmatmul.msk.f32.vlgmr.msrb.gmra.mxu3 %vm263_vm5, %v1077_v33 }
 0x543   :  { %1401 = vmatmul.msk.f32.vlgmr.msra.gmra.mxu0 %vm263_vm5, %v1077_v33 }
 0x5c0   :  { %v1183_v50 = vpop.f32.mrf.mxu0 }
 0x5c1   :  { %v1184_v1 = vadd.f32 %v1832_v35, %v1183_v50 }
 0x5c3   :  { %v1187_v61 = vrot.slane %v1184_v1, 4 }
 0x5c5   :  { %v1097_v34 = vpop.f32.mrf.mxu2  ;;  %v1117_v36 = vpop.f32.mrf.mxu3 }
 0x5c6   :  { %v1121_v37 = vrot.slane %v1097_v34, 4  ;;  %v1144_v38 = vrot.slane %v1117_v36, 4 }
 0x5c8   :  { %v1123_v12 = vadd.f32 %v1121_v37, %v1817_v18  ;;  %v1146_v40 = vadd.f32 %v1144_v38, %v1824_v25 }
 0x5ca   :  { %v1399_v41 = vmul.f32 -1.442695, %v1123_v12  ;;  %v1400_v42 = vmul.f32 -1.442695, %v1146_v40 }
 0x5cc   :  { %1487 = vpow2.f32 %v1399_v41 }
 0x5cd   :  { %1489 = vpow2.f32 %v1400_v42 }
 0x5d2   :  { %v1488_v23 = vpop.eup %1487 }
 0x5d3   :  { %v1490_v43 = vpop.eup %1489  ;;  %v1127_v44 = vadd.f32 1.0, %v1488_v23 }
 0x5d4   :  { %v1150_v45 = vadd.f32 1.0, %v1490_v43 }
 0x5d5   :  { %1491 = vrcp.f32 %v1127_v44  ;;  %v1139_v51 = vand.u32 2147483648, %v1127_v44  ;;  %v1137_v3 = vand.u32 2147483647, %v1127_v44  ;;  %vm1133_vm13 = vweird.f32 %v1127_v44 }
 0x5d6   :  { %1493 = vrcp.f32 %v1150_v45  ;;  %v1162_v8 = vand.u32 2147483648, %v1150_v45  ;;  %vm1156_vm1 = vweird.f32 %v1150_v45  ;;  %v1160_v9 = vand.u32 2147483647, %v1150_v45 }
 0x5d7   :  { %v1140_v60 = vor.u32 1.1754944e-38, %v1139_v51  ;;  %vm1138_vm15 = vcmp.eq.f32.partialorder %v1137_v3, 8.507059e+37 }
 0x5d8   :  { %v1163_v13 = vor.u32 1.1754944e-38, %v1162_v8  ;;  %vm1161_vm3 = vcmp.eq.f32.partialorder %v1160_v9, 8.507059e+37 }
 0x5db   :  { %v1492_v46 = vpop.eup %1491 }
 0x5dc   :  { %v1494_v48 = vpop.eup %1493  ;;  %v1129_v49 = vmul.f32 %v1492_v46, %v1127_v44  ;;  %vm1134_vm12 = vweird.f32 %v1492_v46 }
 0x5dd   :  { %v1152_v47 = vmul.f32 %v1494_v48, %v1150_v45  ;;  %vm1135_vm14 = vmor %vm1133_vm13, %vm1134_vm12  ;;  %vm1157_vm0 = vweird.f32 %v1494_v48  ;;  %vm1320_vm12 = vcmask 261126  }
 0x5de   :  { %v1130_v57 = vsub.f32 1.0, %v1129_v49  ;;  %vm1158_vm2 = vmor %vm1156_vm1, %vm1157_vm0 }
 0x5df   :  { %v1153_v0 = vsub.f32 1.0, %v1152_v47 }
 0x5e0   :  { %v1131_v2 = vmul.f32 %v1492_v46, %v1130_v57 }
 0x5e1   :  { %v1154_v4 = vmul.f32 %v1494_v48, %v1153_v0 }
 0x5e2   :  { %v1132_v5 = vadd.f32 %v1492_v46, %v1131_v2 }
 0x5e3   :  { %v1155_v63 = vadd.f32 %v1494_v48, %v1154_v4 }
 0x5e4   :  { %v1136_v6 = vsel %vm1135_vm14, %v1492_v46, %v1132_v5 }
 0x5e5   :  { %v1141_v62 = vsel %vm1138_vm15, %v1140_v60, %v1136_v6  ;;  %v1159_v11 = vsel %vm1158_vm2, %v1494_v48, %v1155_v63 }
 0x5e6   :  { %v1189_v7 = vmul.f32 %v1187_v61, %v1141_v62  ;;  %v1164_v14 = vsel %vm1161_vm3, %v1163_v13, %v1159_v11 }
 0x5e7   :  { %v1192_v54 = vsub.f32 1.0, %v1164_v14  ;;  %v1196_v17 = vmul.f32 %v1194_v19, %v1164_v14 }
 0x5e8   :  { %v1190_v10 = vadd.f32 %v1189_v7, %v1945_v39 }
 0x5ea   :  { %1495 = vtanh.f32 %v1190_v10 }
 0x5f0   :  { %v1496_v52 = vpop.eup %1495 }
 0x5f1   :  { %v1193_v28 = vmul.f32 %v1496_v52, %v1192_v54 }
 0x5f3   :  { %v1973_v56 = vadd.f32 %v1196_v17, %v1193_v28 }
 0x5f5   :  { %v1199_v16 = vrot.slane %v1973_v56, 4  ;;  %v1316_v51 = vrot.slane %v1973_v56, 6 }
 0x5f7   :  { %1402 = vmatmul.msk.f32.vlgmr.msra.gmra.mxu1 %vm263_vm5, %v1199_v16  ;;  %1403 = vmatmul.msk.f32.vlgmr.msra.gmra.mxu2 %vm263_vm5, %v1199_v16 }
 0x5f8   :  { %1406 = vmatmul.msk.f32.vlgmr.msra.gmra.mxu3 %vm263_vm5, %v1199_v16 }
 0x674   :  { %v1219_v53 = vpop.f32.mrf.mxu1 }
 0x675   :  { %v1243_v15 = vrot.slane %v1219_v53, 2 }
 0x677   :  { %v1245_v58 = vadd.f32 %v1243_v15, %v1817_v18 }
 0x679   :  { %v1404_v20 = vmul.f32 -1.442695, %v1245_v58 }
 0x67a   :  { %v1239_v55 = vpop.f32.mrf.mxu2 }
 0x67b   :  { %1497 = vpow2.f32 %v1404_v20  ;;  %v1266_v21 = vrot.slane %v1239_v55, 2  ;;  %v1305_v32 = vpop.f32.mrf.mxu3 }
 0x67c   :  { %v1306_v37 = vadd.f32 %v1832_v35, %v1305_v32 }
 0x67d   :  { %v1268_v59 = vadd.f32 %v1266_v21, %v1824_v25 }
 0x67e   :  { %v1309_v23 = vrot.slane %v1306_v37, 2 }
 0x67f   :  { %v1405_v22 = vmul.f32 -1.442695, %v1268_v59 }
 0x681   :  { %v1498_v24 = vpop.eup %1497  ;;  %1499 = vpow2.f32 %v1405_v22 }
 0x682   :  { %v1249_v26 = vadd.f32 1.0, %v1498_v24 }
 0x684   :  { %1501 = vrcp.f32 %v1249_v26  ;;  %v1261_v34 = vand.u32 2147483648, %v1249_v26  ;;  %v1259_v36 = vand.u32 2147483647, %v1249_v26  ;;  %vm1255_vm4 = vweird.f32 %v1249_v26 }
 0x686   :  { %v1262_v40 = vor.u32 1.1754944e-38, %v1261_v34  ;;  %vm1260_vm7 = vcmp.eq.f32.partialorder %v1259_v36, 8.507059e+37 }
 0x687   :  { %v1500_v27 = vpop.eup %1499 }
 0x688   :  { %v1272_v29 = vadd.f32 1.0, %v1500_v27 }
 0x68a   :  { %v1502_v30 = vpop.eup %1501  ;;  %1503 = vrcp.f32 %v1272_v29  ;;  %v1284_v45 = vand.u32 2147483648, %v1272_v29  ;;  %v1282_v48 = vand.u32 2147483647, %v1272_v29  ;;  %vm1278_vm9 = vweird.f32 %v1272_v29 }
 0x68b   :  { %v1251_v31 = vmul.f32 %v1502_v30, %v1249_v26  ;;  %vm1256_vm5 = vweird.f32 %v1502_v30 }
 0x68c   :  { %vm1257_vm6 = vmor %vm1255_vm4, %vm1256_vm5  ;;  %v1285_v50 = vor.u32 1.1754944e-38, %v1284_v45  ;;  %vm1283_vm11 = vcmp.eq.f32.partialorder %v1282_v48, 8.507059e+37 }
 0x68d   :  { %v1252_v33 = vsub.f32 1.0, %v1251_v31 }
 0x68f   :  { %v1253_v18 = vmul.f32 %v1502_v30, %v1252_v33 }
 0x690   :  { %v1504_v38 = vpop.eup %1503 }
 0x691   :  { %v1274_v25 = vmul.f32 %v1504_v38, %v1272_v29  ;;  %v1254_v12 = vadd.f32 %v1502_v30, %v1253_v18  ;;  %vm1279_vm8 = vweird.f32 %v1504_v38 }
 0x692   :  { %vm1280_vm10 = vmor %vm1278_vm9, %vm1279_vm8 }
 0x693   :  { %v1275_v41 = vsub.f32 1.0, %v1274_v25  ;;  %v1258_v42 = vsel %vm1257_vm6, %v1502_v30, %v1254_v12 }
 0x694   :  { %v1263_v43 = vsel %vm1260_vm7, %v1262_v40, %v1258_v42 }
 0x695   :  { %v1276_v44 = vmul.f32 %v1504_v38, %v1275_v41  ;;  %v1311_v46 = vmul.f32 %v1309_v23, %v1263_v43 }
 0x697   :  { %v1277_v49 = vadd.f32 %v1504_v38, %v1276_v44  ;;  %v1312_v35 = vadd.f32 %v1311_v46, %v1945_v39 }
 0x699   :  { %v1281_v47 = vsel %vm1280_vm10, %v1504_v38, %v1277_v49  ;;  %1505 = vtanh.f32 %v1312_v35 }
 0x69a   :  { %v1286_v57 = vsel %vm1283_vm11, %v1285_v50, %v1281_v47 }
 0x69b   :  { %v1314_v0 = vsub.f32 1.0, %v1286_v57  ;;  %v1318_v3 = vmul.f32 %v1316_v51, %v1286_v57 }
 0x69f   :  { %v1506_v1 = vpop.eup %1505 }
 0x6a0   :  { %v1315_v2 = vmul.f32 %v1506_v1, %v1314_v0 }
 0x6a2   :  { %v1319_v39 = vadd.f32 %v1318_v3, %v1315_v2 }
 0x6a4   :  { %1321 = vst.msk [vmem:[#allocation12 - $0x6] sm:$0xc0] %vm1320_vm12, %v1319_v39 }
 0x6a5   :  { %1343 = dma.vmem_to_hbm [thread:$0]  %s1339_s20, 32, %s1341_s23, [#allocation13]  }
 0x6a6   :  { %1631 = dma.done.wait [#allocation7], 64  }
 0x6a7   :  { %1632 = vsyncadd [#allocation7], 4294967232 }
 0x6a8   :  { %1633 = dma.done.wait [#allocation13], 32  }
 0x6a9   :  { %1634 = vsyncadd [#allocation13], 4294967264 }
 0x6aa   :  { %1352 = vsyncpa [#allocation6], 1 }
 0x6ab   :  { %1353 = vsyncpa [#allocation9], 1 }
 0x6ac   :  { %1354 = vsyncpa [#allocation7], 1 }
 0x6ad   :  { %1355 = vsyncpa [#allocation13], 1 }

</bundles_post_ra>
